<compile_context>
chip_gen: v7x
topology: tpu7x:2x2x1
jax: 0.10.0
libtpu: 0.0.40
codegen_flags: <defaults>
</compile_context>

<pallas_src>
import numpy as np
import jax
import jax.numpy as jnp
from jax.experimental import pallas as pl
from jax.experimental.pallas import tpu as pltpu

GN_EPS = 1e-5
NUM_GROUPS = 8


# ----------------------------- fused kernel ---------------------------------


def _bottleneck_kernel(x_ref, tadd_ref, g1_ref, be1_ref, g2_ref, be2_ref,
                       wb1_ref, wb2_ref, b2_ref, m_ref, mt_ref, o_ref):
    """TB samples per grid step; activations stay lane-dense (TB, H, W*C) in VMEM."""
    TB, H, WC = x_ref.shape
    M = TB * H                                  # matmul row count (target 128-256)
    G = m_ref.shape[1]
    n = jnp.float32(H * WC // G)                # elements per GroupNorm group

    # Sample-boundary masks for the row-shifted conv taps (shared by both convs).
    row = jax.lax.broadcasted_iota(jnp.int32, (TB, H, 1), 1).reshape(M, 1)
    not_first = row != 0                        # zero the "up" tap on each sample's row 0
    not_last = row != (H - 1)                   # zero the "down" tap on each sample's last row

    def silu(y):
        # divide goes to the otherwise-idle EUP slot
        return y * pl.reciprocal(1.0 + jnp.exp(-y), approx=True)

    def gn_silu(x3, gamma_ref, beta_ref):
        # Per-sample GroupNorm over (H, W, C/G) via tiny membership matmuls.
        ch_sum = jnp.sum(x3, axis=1)                                                    # (TB, WC)
        g_mean = jnp.dot(ch_sum, m_ref[...], preferred_element_type=jnp.float32) / n    # (TB, G)
        mean_l = jnp.dot(g_mean, mt_ref[...], preferred_element_type=jnp.float32)       # (TB, WC)
        d = x3 - mean_l[:, None, :]
        ch_sq = jnp.sum(d * d, axis=1)                                                   # (TB, WC)
        g_var = jnp.dot(ch_sq, m_ref[...], preferred_element_type=jnp.float32) / n       # (TB, G)
        inv_l = jnp.dot(jax.lax.rsqrt(g_var + GN_EPS), mt_ref[...],
                        preferred_element_type=jnp.float32)                              # (TB, WC)
        y = (d * inv_l[:, None, :] * gamma_ref[...].reshape(1, 1, WC)
             + beta_ref[...].reshape(1, 1, WC))
        return silu(y)

    def conv3x3(h3, wb_ref):
        # Three bf16 band dots (no im2col scratch, no VMEM round-trip): the banded
        # weight handles the width (W) shifts, pltpu.roll + masks handle the height shifts.
        h2 = h3.reshape(M, WC)
        mid = h2.astype(jnp.bfloat16)
        up = jnp.where(not_first, pltpu.roll(h2, 1, axis=0), 0.0).astype(jnp.bfloat16)
        dn = jnp.where(not_last, pltpu.roll(h2, M - 1, axis=0), 0.0).astype(jnp.bfloat16)
        out = (jnp.dot(up, wb_ref[0:WC, :], preferred_element_type=jnp.float32)
               + jnp.dot(mid, wb_ref[WC:2 * WC, :], preferred_element_type=jnp.float32)
               + jnp.dot(dn, wb_ref[2 * WC:3 * WC, :], preferred_element_type=jnp.float32))
        return out.reshape(TB, H, WC)

    x = x_ref[...].astype(jnp.float32)                           # (TB, H, WC)
    h = gn_silu(x, g1_ref, be1_ref)                              # SiLU(GN1(x))
    h = conv3x3(h, wb1_ref) + tadd_ref[...][:, None, :]          # conv1 + b1 + SiLU(time_proj)
    h = gn_silu(h, g2_ref, be2_ref)                              # SiLU(GN2(.))
    # TODO(synk): Dropout2d is identity in eval mode; training-mode channel dropout not implemented.
    h = conv3x3(h, wb2_ref) + b2_ref[...].reshape(1, 1, WC)      # conv2 + b2
    o_ref[...] = h.astype(o_ref.dtype)


# ----------------------------- wrapper ---------------------------------------


def _banded_conv_weights(w_hwio, W, dtype=jnp.bfloat16):
    """Fold (3,3,Cin,Cout) conv weights into a (3*W*Cin, W*Cout) banded matrix so a
    3x3 SAME conv is three (M, W*Cin)@(W*Cin, W*Cout) band dots (rows 0:WC -> dh=0 / up,
    WC:2WC -> dh=1 / center, 2WC:3WC -> dh=2 / down).  bf16 for MXU-native passes.
    NOTE: grows quadratically in W*C (WC=2048 -> 24 MiB/conv in bf16); for large W*C
    tile the matmul over N/K with an extra grid axis (+ vmem_limit_bytes) or switch to
    dense im2col (H*W, 9*C)@(9*C, C)."""
    KH, KW, Cin, Cout = w_hwio.shape
    S = np.zeros((KW, W, W), np.float32)        # S[dw, w', w] = 1 iff w' == w + dw - 1
    for dw in range(KW):
        for w in range(W):
            wp = w + dw - 1
            if 0 <= wp < W:
                S[dw, wp, w] = 1.0
    wb = jnp.einsum('dpw,hdio->hpiwo', jnp.asarray(S), w_hwio.astype(jnp.float32))
    return wb.reshape(KH * W * Cin, W * Cout).astype(dtype)


def _group_membership(C, W, groups):
    """Lane -> group one-hot membership for the (H, W*C) layout: (W*C, G) and (G, W*C)."""
    cpg = C // groups
    ch = np.arange(W * C) % C
    m = (ch[:, None] // cpg == np.arange(groups)[None, :]).astype(np.float32)
    return jnp.asarray(m), jnp.asarray(np.ascontiguousarray(m.T))


def _pick_tb(B, H):
    """Samples per grid step: target M = TB*H ~ 256 MXU rows, TB | B; keep >=2 grid
    steps (both v7x TensorCores) when that does not push M below 128."""
    tb = max(1, min(B, 256 // max(H, 1)))
    while B % tb:
        tb -= 1
    if B // tb == 1 and tb % 2 == 0 and (tb // 2) * H >= 128:
        tb //= 2
    return tb


def bottleneck_block_forward(x_nchw, time_emb, p):
    """Matches BottleneckBlock.forward (eval mode).  Single fused Pallas kernel."""
    B, C, H, W = x_nchw.shape
    WC = W * C
    G = NUM_GROUPS
    TB = _pick_tb(B, H)

    # TODO(synk): at production sizes keep activations in this lane-dense (B, H, W*C)
    # layout across neighboring blocks instead of paying NCHW<->NHWC HBM transposes here.
    x_ld = jnp.transpose(x_nchw, (0, 2, 3, 1)).reshape(B, H, WC)

    def lane_tile(v):                            # (C,) -> (1, W*C) matching lane layout
        return jnp.tile(v.astype(jnp.float32), W).reshape(1, WC)

    # SiLU(Linear(time_emb)) + conv1 bias, precomputed per sample and lane-tiled (B, WC).
    tproj = time_emb.astype(jnp.float32) @ p["lin_w"].T.astype(jnp.float32) + p["lin_b"]
    tadd = jnp.tile(tproj * jax.nn.sigmoid(tproj) + p["b1"], (1, W))

    wb1 = _banded_conv_weights(p["w1_hwio"], W)          # (3*WC, WC) bf16
    wb2 = _banded_conv_weights(p["w2_hwio"], W)
    memb, memb_t = _group_membership(C, W, G)

    const = lambda shape: pl.BlockSpec(shape, lambda b: (0, 0))

    out = pl.pallas_call(
        _bottleneck_kernel,
        out_shape=jax.ShapeDtypeStruct((B, H, WC), jnp.float32),
        grid=(B // TB,),
        in_specs=[
            pl.BlockSpec((TB, H, WC), lambda b: (b, 0, 0)),   # x slab (TB samples)
            pl.BlockSpec((TB, WC), lambda b: (b, 0)),         # SiLU(time_proj)+b1 (per sample)
            const((1, WC)), const((1, WC)),                   # gamma1, beta1
            const((1, WC)), const((1, WC)),                   # gamma2, beta2
            const((3 * WC, WC)),                              # conv1 banded weights (bf16)
            const((3 * WC, WC)),                              # conv2 banded weights (bf16)
            const((1, WC)),                                   # conv2 bias
            const((WC, G)), const((G, WC)),                   # group membership, transpose
        ],
        out_specs=pl.BlockSpec((TB, H, WC), lambda b: (b, 0, 0)),
        compiler_params=pltpu.CompilerParams(dimension_semantics=("parallel",)),
    )(x_ld, tadd,
      lane_tile(p["g1"]), lane_tile(p["beta1"]),
      lane_tile(p["g2"]), lane_tile(p["beta2"]),
      wb1, wb2, lane_tile(p["b2"]), memb, memb_t)

    return jnp.transpose(out.reshape(B, H, W, C), (0, 3, 1, 2))   # back to NCHW


# ----------------------------- reference (pure JAX) ---------------------------


def ref_forward(x_nchw, time_emb, p):
    def silu(v):
        return v * jax.nn.sigmoid(v)

    def gn(x, gamma, beta):
        B, C, H, W = x.shape
        xg = x.reshape(B, NUM_GROUPS, C // NUM_GROUPS, H, W)
        mean = xg.mean(axis=(2, 3, 4), keepdims=True)
        var = xg.var(axis=(2, 3, 4), keepdims=True)
        xn = ((xg - mean) / jnp.sqrt(var + GN_EPS)).reshape(B, C, H, W)
        return xn * gamma[None, :, None, None] + beta[None, :, None, None]

    def conv(x, w_oihw, b):
        y = jax.lax.conv_general_dilated(x, w_oihw, (1, 1), "SAME",
                                         dimension_numbers=("NCHW", "OIHW", "NCHW"))
        return y + b[None, :, None, None]

    tproj = time_emb @ p["lin_w"].T + p["lin_b"]
    h = silu(gn(x_nchw, p["g1"], p["beta1"]))
    h = conv(h, p["w1_oihw"], p["b1"])
    h = h + silu(tproj)[:, :, None, None]
    h = silu(gn(h, p["g2"], p["beta2"]))
    h = conv(h, p["w2_oihw"], p["b2"])
    return h


# ----------------------------- main -------------------------------------------


if __name__ == "__main__":
    B, C, H, W, T = 2, 16, 16, 16, 32   # channels must be divisible by 8 (GroupNorm groups)

    key = jax.random.PRNGKey(0)
    ks = jax.random.split(key, 12)

    def uinit(k, shape, fan_in):
        bound = 1.0 / jnp.sqrt(jnp.float32(fan_in))
        return jax.random.uniform(k, shape, jnp.float32, -bound, bound)

    w1_oihw = uinit(ks[0], (C, C, 3, 3), C * 9)
    b1 = uinit(ks[1], (C,), C * 9)
    w2_oihw = uinit(ks[2], (C, C, 3, 3), C * 9)
    b2 = uinit(ks[3], (C,), C * 9)
    lin_w = uinit(ks[4], (C, T), T)
    lin_b = uinit(ks[5], (C,), T)
    g1 = 1.0 + 0.1 * jax.random.normal(ks[6], (C,), jnp.float32)
    beta1 = 0.1 * jax.random.normal(ks[7], (C,), jnp.float32)
    g2 = 1.0 + 0.1 * jax.random.normal(ks[8], (C,), jnp.float32)
    beta2 = 0.1 * jax.random.normal(ks[9], (C,), jnp.float32)

    params = dict(
        w1_oihw=w1_oihw, w1_hwio=jnp.transpose(w1_oihw, (2, 3, 1, 0)), b1=b1,
        w2_oihw=w2_oihw, w2_hwio=jnp.transpose(w2_oihw, (2, 3, 1, 0)), b2=b2,
        lin_w=lin_w, lin_b=lin_b,
        g1=g1, beta1=beta1, g2=g2, beta2=beta2,
    )

    x = jax.random.normal(ks[10], (B, C, H, W), jnp.float32)
    time_emb = jax.random.normal(ks[11], (B, T), jnp.float32)

    fwd = jax.jit(bottleneck_block_forward)
    out = jax.block_until_ready(fwd(x, time_emb, params))

    ref = jax.block_until_ready(ref_forward(x, time_emb, params))
    assert out.shape == (B, C, H, W)
    err = float(jnp.max(jnp.abs(out - ref)))
    # tolerance relaxed vs f32 reference: conv operands are bf16 on the MXU (per perf review)
    assert jnp.allclose(out, ref, rtol=1e-2, atol=1e-2), err

    print("KERNEL_OK")
</pallas_src>

<mosaic_0001>
module attributes {stable_mosaic.version = 11 : i64} {
  func.func @_bottleneck_kernel(%arg0: i32, %arg1: memref<2x16x256xf32, #tpu.memory_space<vmem>>, %arg2: memref<2x256xf32, #tpu.memory_space<vmem>>, %arg3: memref<1x256xf32, #tpu.memory_space<vmem>>, %arg4: memref<1x256xf32, #tpu.memory_space<vmem>>, %arg5: memref<1x256xf32, #tpu.memory_space<vmem>>, %arg6: memref<1x256xf32, #tpu.memory_space<vmem>>, %arg7: memref<768x256xbf16, #tpu.memory_space<vmem>>, %arg8: memref<768x256xbf16, #tpu.memory_space<vmem>>, %arg9: memref<1x256xf32, #tpu.memory_space<vmem>>, %arg10: memref<256x8xf32, #tpu.memory_space<vmem>>, %arg11: memref<8x256xf32, #tpu.memory_space<vmem>>, %arg12: memref<2x16x256xf32, #tpu.memory_space<vmem>>) attributes {dimension_semantics = [#tpu.dimension_semantics<parallel>], iteration_bounds = array<i64: 1>, scalar_prefetch = 0 : i64, scratch_operands = 0 : i64, tpu.core_type = #tpu.core_type<tc>, window_params = [{transform_indices = @transform_0, window_bounds = array<i64: 2, 16, 256>}, {transform_indices = @transform_1, window_bounds = array<i64: 2, 256>}, {pipeline_mode = #tpu.pipeline_mode<synchronous>, transform_indices = @transform_2, window_bounds = array<i64: 1, 256>}, {pipeline_mode = #tpu.pipeline_mode<synchronous>, transform_indices = @transform_3, window_bounds = array<i64: 1, 256>}, {pipeline_mode = #tpu.pipeline_mode<synchronous>, transform_indices = @transform_4, window_bounds = array<i64: 1, 256>}, {pipeline_mode = #tpu.pipeline_mode<synchronous>, transform_indices = @transform_5, window_bounds = array<i64: 1, 256>}, {pipeline_mode = #tpu.pipeline_mode<synchronous>, transform_indices = @transform_6, window_bounds = array<i64: 768, 256>}, {pipeline_mode = #tpu.pipeline_mode<synchronous>, transform_indices = @transform_7, window_bounds = array<i64: 768, 256>}, {pipeline_mode = #tpu.pipeline_mode<synchronous>, transform_indices = @transform_8, window_bounds = array<i64: 1, 256>}, {pipeline_mode = #tpu.pipeline_mode<synchronous>, transform_indices = @transform_9, window_bounds = array<i64: 256, 8>}, {pipeline_mode = #tpu.pipeline_mode<synchronous>, transform_indices = @transform_10, window_bounds = array<i64: 8, 256>}, {transform_indices = @transform_11, window_bounds = array<i64: 2, 16, 256>}]} {
    %0 = tpu.iota {dimensions = array<i32: 1>} : vector<2x16x1xi32>
    %1 = vector.shape_cast %0 : vector<2x16x1xi32> to vector<32x1xi32>
    %c0_i32 = arith.constant 0 : i32
    %2 = vector.broadcast %c0_i32 : i32 to vector<32x1xi32>
    %3 = arith.cmpi ne, %1, %2 : vector<32x1xi32>
    %c15_i32 = arith.constant 15 : i32
    %4 = vector.broadcast %c15_i32 : i32 to vector<32x1xi32>
    %5 = arith.cmpi ne, %1, %4 : vector<32x1xi32>
    %c0 = arith.constant 0 : index
    %c0_0 = arith.constant 0 : index
    %c0_1 = arith.constant 0 : index
    %6 = vector.load %arg1[%c0, %c0_0, %c0_1] : memref<2x16x256xf32, #tpu.memory_space<vmem>>, vector<2x16x256xf32>
    %cst = arith.constant dense<0.000000e+00> : vector<2x256xf32>
    %7 = vector.multi_reduction <add>, %6, %cst [1] : vector<2x16x256xf32> to vector<2x256xf32>
    %c0_2 = arith.constant 0 : index
    %c0_3 = arith.constant 0 : index
    %8 = vector.load %arg10[%c0_2, %c0_3] : memref<256x8xf32, #tpu.memory_space<vmem>>, vector<256x8xf32>
    %cst_4 = arith.constant dense<0.000000e+00> : vector<2x8xf32>
    %9 = tpu.matmul %7, %8, %cst_4 {dimension_numbers = #tpu.dot_dimension_numbers<[1], [0], [0], [1], [0, 0, 1, 1], [], []>} : vector<2x256xf32>, vector<256x8xf32>, vector<2x8xf32> -> vector<2x8xf32>
    %cst_5 = arith.constant 5.120000e+02 : f32
    %10 = vector.broadcast %cst_5 : f32 to vector<2x8xf32>
    %11 = arith.divf %9, %10 : vector<2x8xf32>
    %c0_6 = arith.constant 0 : index
    %c0_7 = arith.constant 0 : index
    %12 = vector.load %arg11[%c0_6, %c0_7] : memref<8x256xf32, #tpu.memory_space<vmem>>, vector<8x256xf32>
    %cst_8 = arith.constant dense<0.000000e+00> : vector<2x256xf32>
    %13 = tpu.matmul %11, %12, %cst_8 {dimension_numbers = #tpu.dot_dimension_numbers<[1], [0], [0], [1], [0, 0, 1, 1], [], []>} : vector<2x8xf32>, vector<8x256xf32>, vector<2x256xf32> -> vector<2x256xf32>
    %14 = vector.shape_cast %13 : vector<2x256xf32> to vector<2x1x256xf32>
    %15 = vector.broadcast %14 : vector<2x1x256xf32> to vector<2x16x256xf32>
    %16 = arith.subf %6, %15 : vector<2x16x256xf32>
    %17 = arith.mulf %16, %16 : vector<2x16x256xf32>
    %cst_9 = arith.constant dense<0.000000e+00> : vector<2x256xf32>
    %18 = vector.multi_reduction <add>, %17, %cst_9 [1] : vector<2x16x256xf32> to vector<2x256xf32>
    %c0_10 = arith.constant 0 : index
    %c0_11 = arith.constant 0 : index
    %19 = vector.load %arg10[%c0_10, %c0_11] : memref<256x8xf32, #tpu.memory_space<vmem>>, vector<256x8xf32>
    %cst_12 = arith.constant dense<0.000000e+00> : vector<2x8xf32>
    %20 = tpu.matmul %18, %19, %cst_12 {dimension_numbers = #tpu.dot_dimension_numbers<[1], [0], [0], [1], [0, 0, 1, 1], [], []>} : vector<2x256xf32>, vector<256x8xf32>, vector<2x8xf32> -> vector<2x8xf32>
    %cst_13 = arith.constant 5.120000e+02 : f32
    %21 = vector.broadcast %cst_13 : f32 to vector<2x8xf32>
    %22 = arith.divf %20, %21 : vector<2x8xf32>
    %cst_14 = arith.constant 9.99999974E-6 : f32
    %23 = vector.broadcast %cst_14 : f32 to vector<2x8xf32>
    %24 = arith.addf %22, %23 : vector<2x8xf32>
    %25 = math.rsqrt %24 : vector<2x8xf32>
    %c0_15 = arith.constant 0 : index
    %c0_16 = arith.constant 0 : index
    %26 = vector.load %arg11[%c0_15, %c0_16] : memref<8x256xf32, #tpu.memory_space<vmem>>, vector<8x256xf32>
    %cst_17 = arith.constant dense<0.000000e+00> : vector<2x256xf32>
    %27 = tpu.matmul %25, %26, %cst_17 {dimension_numbers = #tpu.dot_dimension_numbers<[1], [0], [0], [1], [0, 0, 1, 1], [], []>} : vector<2x8xf32>, vector<8x256xf32>, vector<2x256xf32> -> vector<2x256xf32>
    %28 = vector.shape_cast %27 : vector<2x256xf32> to vector<2x1x256xf32>
    %29 = vector.broadcast %28 : vector<2x1x256xf32> to vector<2x16x256xf32>
    %30 = arith.mulf %16, %29 : vector<2x16x256xf32>
    %c0_18 = arith.constant 0 : index
    %c0_19 = arith.constant 0 : index
    %31 = vector.load %arg3[%c0_18, %c0_19] : memref<1x256xf32, #tpu.memory_space<vmem>>, vector<1x256xf32>
    %32 = vector.shape_cast %31 : vector<1x256xf32> to vector<1x1x256xf32>
    %33 = vector.broadcast %32 : vector<1x1x256xf32> to vector<2x16x256xf32>
    %34 = arith.mulf %30, %33 : vector<2x16x256xf32>
    %c0_20 = arith.constant 0 : index
    %c0_21 = arith.constant 0 : index
    %35 = vector.load %arg4[%c0_20, %c0_21] : memref<1x256xf32, #tpu.memory_space<vmem>>, vector<1x256xf32>
    %36 = vector.shape_cast %35 : vector<1x256xf32> to vector<1x1x256xf32>
    %37 = vector.broadcast %36 : vector<1x1x256xf32> to vector<2x16x256xf32>
    %38 = arith.addf %34, %37 : vector<2x16x256xf32>
    %cst_22 = arith.constant 0.000000e+00 : f32
    %39 = vector.broadcast %cst_22 : f32 to vector<2x16x256xf32>
    %40 = arith.subf %39, %38 : vector<2x16x256xf32>
    %41 = math.exp %40 : vector<2x16x256xf32>
    %cst_23 = arith.constant 1.000000e+00 : f32
    %42 = vector.broadcast %cst_23 : f32 to vector<2x16x256xf32>
    %43 = arith.addf %42, %41 : vector<2x16x256xf32>
    %44 = tpu.reciprocal %43 {approx = true} : vector<2x16x256xf32> -> vector<2x16x256xf32>
    %45 = arith.mulf %38, %44 : vector<2x16x256xf32>
    %46 = vector.shape_cast %45 : vector<2x16x256xf32> to vector<32x256xf32>
    %47 = arith.truncf %46 : vector<32x256xf32> to vector<32x256xbf16>
    %c1_i32 = arith.constant 1 : i32
    %48 = tpu.dynamic_rotate %46 by %c1_i32 dim 0 : vector<32x256xf32>, i32 -> vector<32x256xf32>
    %cst_24 = arith.constant 0.000000e+00 : f32
    %49 = vector.shape_cast %3 : vector<32x1xi1> to vector<32x1xi1>
    %50 = vector.broadcast %49 : vector<32x1xi1> to vector<32x256xi1>
    %51 = vector.broadcast %cst_24 : f32 to vector<32x256xf32>
    %52 = arith.select %50, %48, %51 : vector<32x256xi1>, vector<32x256xf32>
    %53 = arith.truncf %52 : vector<32x256xf32> to vector<32x256xbf16>
    %c31_i32 = arith.constant 31 : i32
    %54 = tpu.dynamic_rotate %46 by %c31_i32 dim 0 : vector<32x256xf32>, i32 -> vector<32x256xf32>
    %cst_25 = arith.constant 0.000000e+00 : f32
    %55 = vector.shape_cast %5 : vector<32x1xi1> to vector<32x1xi1>
    %56 = vector.broadcast %55 : vector<32x1xi1> to vector<32x256xi1>
    %57 = vector.broadcast %cst_25 : f32 to vector<32x256xf32>
    %58 = arith.select %56, %54, %57 : vector<32x256xi1>, vector<32x256xf32>
    %59 = arith.truncf %58 : vector<32x256xf32> to vector<32x256xbf16>
    %c0_26 = arith.constant 0 : index
    %c0_27 = arith.constant 0 : index
    %60 = vector.load %arg7[%c0_26, %c0_27] : memref<768x256xbf16, #tpu.memory_space<vmem>>, vector<256x256xbf16>
    %cst_28 = arith.constant dense<0.000000e+00> : vector<32x256xf32>
    %61 = tpu.matmul %53, %60, %cst_28 {dimension_numbers = #tpu.dot_dimension_numbers<[1], [0], [0], [1], [0, 0, 1, 1], [], []>} : vector<32x256xbf16>, vector<256x256xbf16>, vector<32x256xf32> -> vector<32x256xf32>
    %c256 = arith.constant 256 : index
    %c0_29 = arith.constant 0 : index
    %62 = vector.load %arg7[%c256, %c0_29] : memref<768x256xbf16, #tpu.memory_space<vmem>>, vector<256x256xbf16>
    %cst_30 = arith.constant dense<0.000000e+00> : vector<32x256xf32>
    %63 = tpu.matmul %47, %62, %cst_30 {dimension_numbers = #tpu.dot_dimension_numbers<[1], [0], [0], [1], [0, 0, 1, 1], [], []>} : vector<32x256xbf16>, vector<256x256xbf16>, vector<32x256xf32> -> vector<32x256xf32>
    %64 = arith.addf %61, %63 : vector<32x256xf32>
    %c512 = arith.constant 512 : index
    %c0_31 = arith.constant 0 : index
    %65 = vector.load %arg7[%c512, %c0_31] : memref<768x256xbf16, #tpu.memory_space<vmem>>, vector<256x256xbf16>
    %cst_32 = arith.constant dense<0.000000e+00> : vector<32x256xf32>
    %66 = tpu.matmul %59, %65, %cst_32 {dimension_numbers = #tpu.dot_dimension_numbers<[1], [0], [0], [1], [0, 0, 1, 1], [], []>} : vector<32x256xbf16>, vector<256x256xbf16>, vector<32x256xf32> -> vector<32x256xf32>
    %67 = arith.addf %64, %66 : vector<32x256xf32>
    %68 = vector.shape_cast %67 : vector<32x256xf32> to vector<2x16x256xf32>
    %c0_33 = arith.constant 0 : index
    %c0_34 = arith.constant 0 : index
    %69 = vector.load %arg2[%c0_33, %c0_34] : memref<2x256xf32, #tpu.memory_space<vmem>>, vector<2x256xf32>
    %70 = vector.shape_cast %69 : vector<2x256xf32> to vector<2x1x256xf32>
    %71 = vector.broadcast %70 : vector<2x1x256xf32> to vector<2x16x256xf32>
    %72 = arith.addf %68, %71 : vector<2x16x256xf32>
    %cst_35 = arith.constant dense<0.000000e+00> : vector<2x256xf32>
    %73 = vector.multi_reduction <add>, %72, %cst_35 [1] : vector<2x16x256xf32> to vector<2x256xf32>
    %c0_36 = arith.constant 0 : index
    %c0_37 = arith.constant 0 : index
    %74 = vector.load %arg10[%c0_36, %c0_37] : memref<256x8xf32, #tpu.memory_space<vmem>>, vector<256x8xf32>
    %cst_38 = arith.constant dense<0.000000e+00> : vector<2x8xf32>
    %75 = tpu.matmul %73, %74, %cst_38 {dimension_numbers = #tpu.dot_dimension_numbers<[1], [0], [0], [1], [0, 0, 1, 1], [], []>} : vector<2x256xf32>, vector<256x8xf32>, vector<2x8xf32> -> vector<2x8xf32>
    %cst_39 = arith.constant 5.120000e+02 : f32
    %76 = vector.broadcast %cst_39 : f32 to vector<2x8xf32>
    %77 = arith.divf %75, %76 : vector<2x8xf32>
    %c0_40 = arith.constant 0 : index
    %c0_41 = arith.constant 0 : index
    %78 = vector.load %arg11[%c0_40, %c0_41] : memref<8x256xf32, #tpu.memory_space<vmem>>, vector<8x256xf32>
    %cst_42 = arith.constant dense<0.000000e+00> : vector<2x256xf32>
    %79 = tpu.matmul %77, %78, %cst_42 {dimension_numbers = #tpu.dot_dimension_numbers<[1], [0], [0], [1], [0, 0, 1, 1], [], []>} : vector<2x8xf32>, vector<8x256xf32>, vector<2x256xf32> -> vector<2x256xf32>
    %80 = vector.shape_cast %79 : vector<2x256xf32> to vector<2x1x256xf32>
    %81 = vector.broadcast %80 : vector<2x1x256xf32> to vector<2x16x256xf32>
    %82 = arith.subf %72, %81 : vector<2x16x256xf32>
    %83 = arith.mulf %82, %82 : vector<2x16x256xf32>
    %cst_43 = arith.constant dense<0.000000e+00> : vector<2x256xf32>
    %84 = vector.multi_reduction <add>, %83, %cst_43 [1] : vector<2x16x256xf32> to vector<2x256xf32>
    %c0_44 = arith.constant 0 : index
    %c0_45 = arith.constant 0 : index
    %85 = vector.load %arg10[%c0_44, %c0_45] : memref<256x8xf32, #tpu.memory_space<vmem>>, vector<256x8xf32>
    %cst_46 = arith.constant dense<0.000000e+00> : vector<2x8xf32>
    %86 = tpu.matmul %84, %85, %cst_46 {dimension_numbers = #tpu.dot_dimension_numbers<[1], [0], [0], [1], [0, 0, 1, 1], [], []>} : vector<2x256xf32>, vector<256x8xf32>, vector<2x8xf32> -> vector<2x8xf32>
    %cst_47 = arith.constant 5.120000e+02 : f32
    %87 = vector.broadcast %cst_47 : f32 to vector<2x8xf32>
    %88 = arith.divf %86, %87 : vector<2x8xf32>
    %cst_48 = arith.constant 9.99999974E-6 : f32
    %89 = vector.broadcast %cst_48 : f32 to vector<2x8xf32>
    %90 = arith.addf %88, %89 : vector<2x8xf32>
    %91 = math.rsqrt %90 : vector<2x8xf32>
    %c0_49 = arith.constant 0 : index
    %c0_50 = arith.constant 0 : index
    %92 = vector.load %arg11[%c0_49, %c0_50] : memref<8x256xf32, #tpu.memory_space<vmem>>, vector<8x256xf32>
    %cst_51 = arith.constant dense<0.000000e+00> : vector<2x256xf32>
    %93 = tpu.matmul %91, %92, %cst_51 {dimension_numbers = #tpu.dot_dimension_numbers<[1], [0], [0], [1], [0, 0, 1, 1], [], []>} : vector<2x8xf32>, vector<8x256xf32>, vector<2x256xf32> -> vector<2x256xf32>
    %94 = vector.shape_cast %93 : vector<2x256xf32> to vector<2x1x256xf32>
    %95 = vector.broadcast %94 : vector<2x1x256xf32> to vector<2x16x256xf32>
    %96 = arith.mulf %82, %95 : vector<2x16x256xf32>
    %c0_52 = arith.constant 0 : index
    %c0_53 = arith.constant 0 : index
    %97 = vector.load %arg5[%c0_52, %c0_53] : memref<1x256xf32, #tpu.memory_space<vmem>>, vector<1x256xf32>
    %98 = vector.shape_cast %97 : vector<1x256xf32> to vector<1x1x256xf32>
    %99 = vector.broadcast %98 : vector<1x1x256xf32> to vector<2x16x256xf32>
    %100 = arith.mulf %96, %99 : vector<2x16x256xf32>
    %c0_54 = arith.constant 0 : index
    %c0_55 = arith.constant 0 : index
    %101 = vector.load %arg6[%c0_54, %c0_55] : memref<1x256xf32, #tpu.memory_space<vmem>>, vector<1x256xf32>
    %102 = vector.shape_cast %101 : vector<1x256xf32> to vector<1x1x256xf32>
    %103 = vector.broadcast %102 : vector<1x1x256xf32> to vector<2x16x256xf32>
    %104 = arith.addf %100, %103 : vector<2x16x256xf32>
    %cst_56 = arith.constant 0.000000e+00 : f32
    %105 = vector.broadcast %cst_56 : f32 to vector<2x16x256xf32>
    %106 = arith.subf %105, %104 : vector<2x16x256xf32>
    %107 = math.exp %106 : vector<2x16x256xf32>
    %cst_57 = arith.constant 1.000000e+00 : f32
    %108 = vector.broadcast %cst_57 : f32 to vector<2x16x256xf32>
    %109 = arith.addf %108, %107 : vector<2x16x256xf32>
    %110 = tpu.reciprocal %109 {approx = true} : vector<2x16x256xf32> -> vector<2x16x256xf32>
    %111 = arith.mulf %104, %110 : vector<2x16x256xf32>
    %112 = vector.shape_cast %111 : vector<2x16x256xf32> to vector<32x256xf32>
    %113 = arith.truncf %112 : vector<32x256xf32> to vector<32x256xbf16>
    %c1_i32_58 = arith.constant 1 : i32
    %114 = tpu.dynamic_rotate %112 by %c1_i32_58 dim 0 : vector<32x256xf32>, i32 -> vector<32x256xf32>
    %cst_59 = arith.constant 0.000000e+00 : f32
    %115 = vector.shape_cast %3 : vector<32x1xi1> to vector<32x1xi1>
    %116 = vector.broadcast %115 : vector<32x1xi1> to vector<32x256xi1>
    %117 = vector.broadcast %cst_59 : f32 to vector<32x256xf32>
    %118 = arith.select %116, %114, %117 : vector<32x256xi1>, vector<32x256xf32>
    %119 = arith.truncf %118 : vector<32x256xf32> to vector<32x256xbf16>
    %c31_i32_60 = arith.constant 31 : i32
    %120 = tpu.dynamic_rotate %112 by %c31_i32_60 dim 0 : vector<32x256xf32>, i32 -> vector<32x256xf32>
    %cst_61 = arith.constant 0.000000e+00 : f32
    %121 = vector.shape_cast %5 : vector<32x1xi1> to vector<32x1xi1>
    %122 = vector.broadcast %121 : vector<32x1xi1> to vector<32x256xi1>
    %123 = vector.broadcast %cst_61 : f32 to vector<32x256xf32>
    %124 = arith.select %122, %120, %123 : vector<32x256xi1>, vector<32x256xf32>
    %125 = arith.truncf %124 : vector<32x256xf32> to vector<32x256xbf16>
    %c0_62 = arith.constant 0 : index
    %c0_63 = arith.constant 0 : index
    %126 = vector.load %arg8[%c0_62, %c0_63] : memref<768x256xbf16, #tpu.memory_space<vmem>>, vector<256x256xbf16>
    %cst_64 = arith.constant dense<0.000000e+00> : vector<32x256xf32>
    %127 = tpu.matmul %119, %126, %cst_64 {dimension_numbers = #tpu.dot_dimension_numbers<[1], [0], [0], [1], [0, 0, 1, 1], [], []>} : vector<32x256xbf16>, vector<256x256xbf16>, vector<32x256xf32> -> vector<32x256xf32>
    %c256_65 = arith.constant 256 : index
    %c0_66 = arith.constant 0 : index
    %128 = vector.load %arg8[%c256_65, %c0_66] : memref<768x256xbf16, #tpu.memory_space<vmem>>, vector<256x256xbf16>
    %cst_67 = arith.constant dense<0.000000e+00> : vector<32x256xf32>
    %129 = tpu.matmul %113, %128, %cst_67 {dimension_numbers = #tpu.dot_dimension_numbers<[1], [0], [0], [1], [0, 0, 1, 1], [], []>} : vector<32x256xbf16>, vector<256x256xbf16>, vector<32x256xf32> -> vector<32x256xf32>
    %130 = arith.addf %127, %129 : vector<32x256xf32>
    %c512_68 = arith.constant 512 : index
    %c0_69 = arith.constant 0 : index
    %131 = vector.load %arg8[%c512_68, %c0_69] : memref<768x256xbf16, #tpu.memory_space<vmem>>, vector<256x256xbf16>
    %cst_70 = arith.constant dense<0.000000e+00> : vector<32x256xf32>
    %132 = tpu.matmul %125, %131, %cst_70 {dimension_numbers = #tpu.dot_dimension_numbers<[1], [0], [0], [1], [0, 0, 1, 1], [], []>} : vector<32x256xbf16>, vector<256x256xbf16>, vector<32x256xf32> -> vector<32x256xf32>
    %133 = arith.addf %130, %132 : vector<32x256xf32>
    %134 = vector.shape_cast %133 : vector<32x256xf32> to vector<2x16x256xf32>
    %c0_71 = arith.constant 0 : index
    %c0_72 = arith.constant 0 : index
    %135 = vector.load %arg9[%c0_71, %c0_72] : memref<1x256xf32, #tpu.memory_space<vmem>>, vector<1x256xf32>
    %136 = vector.shape_cast %135 : vector<1x256xf32> to vector<1x1x256xf32>
    %137 = vector.broadcast %136 : vector<1x1x256xf32> to vector<2x16x256xf32>
    %138 = arith.addf %134, %137 : vector<2x16x256xf32>
    %c0_73 = arith.constant 0 : index
    %c0_74 = arith.constant 0 : index
    %c0_75 = arith.constant 0 : index
    %139 = vector.load %arg12[%c0_73, %c0_74, %c0_75] : memref<2x16x256xf32, #tpu.memory_space<vmem>>, vector<2x16x256xf32>
    tpu.vector_store %arg12[%c0_73, %c0_74, %c0_75], %138 {strides = array<i32>} : memref<2x16x256xf32, #tpu.memory_space<vmem>>, vector<2x16x256xf32>,
    return
  }
  func.func @transform_0(%arg0: i32) -> (i32, i32, i32) {
    %c0_i32 = arith.constant 0 : i32
    %c0_i32_0 = arith.constant 0 : i32
    %c0_i32_1 = arith.constant 0 : i32
    return %arg0, %c0_i32, %c0_i32_0 : i32, i32, i32
  }
  func.func @transform_1(%arg0: i32) -> (i32, i32) {
    %c0_i32 = arith.constant 0 : i32
    %c0_i32_0 = arith.constant 0 : i32
    return %arg0, %c0_i32 : i32, i32
  }
  func.func @transform_2(%arg0: i32) -> (i32, i32) {
    %c0_i32 = arith.constant 0 : i32
    %c0_i32_0 = arith.constant 0 : i32
    %c0_i32_1 = arith.constant 0 : i32
    return %c0_i32, %c0_i32_0 : i32, i32
  }
  func.func @transform_3(%arg0: i32) -> (i32, i32) {
    %c0_i32 = arith.constant 0 : i32
    %c0_i32_0 = arith.constant 0 : i32
    %c0_i32_1 = arith.constant 0 : i32
    return %c0_i32, %c0_i32_0 : i32, i32
  }
  func.func @transform_4(%arg0: i32) -> (i32, i32) {
    %c0_i32 = arith.constant 0 : i32
    %c0_i32_0 = arith.constant 0 : i32
    %c0_i32_1 = arith.constant 0 : i32
    return %c0_i32, %c0_i32_0 : i32, i32
  }
  func.func @transform_5(%arg0: i32) -> (i32, i32) {
    %c0_i32 = arith.constant 0 : i32
    %c0_i32_0 = arith.constant 0 : i32
    %c0_i32_1 = arith.constant 0 : i32
    return %c0_i32, %c0_i32_0 : i32, i32
  }
  func.func @transform_6(%arg0: i32) -> (i32, i32) {
    %c0_i32 = arith.constant 0 : i32
    %c0_i32_0 = arith.constant 0 : i32
    %c0_i32_1 = arith.constant 0 : i32
    return %c0_i32, %c0_i32_0 : i32, i32
  }
  func.func @transform_7(%arg0: i32) -> (i32, i32) {
    %c0_i32 = arith.constant 0 : i32
    %c0_i32_0 = arith.constant 0 : i32
    %c0_i32_1 = arith.constant 0 : i32
    return %c0_i32, %c0_i32_0 : i32, i32
  }
  func.func @transform_8(%arg0: i32) -> (i32, i32) {
    %c0_i32 = arith.constant 0 : i32
    %c0_i32_0 = arith.constant 0 : i32
    %c0_i32_1 = arith.constant 0 : i32
    return %c0_i32, %c0_i32_0 : i32, i32
  }
  func.func @transform_9(%arg0: i32) -> (i32, i32) {
    %c0_i32 = arith.constant 0 : i32
    %c0_i32_0 = arith.constant 0 : i32
    %c0_i32_1 = arith.constant 0 : i32
    return %c0_i32, %c0_i32_0 : i32, i32
  }
  func.func @transform_10(%arg0: i32) -> (i32, i32) {
    %c0_i32 = arith.constant 0 : i32
    %c0_i32_0 = arith.constant 0 : i32
    %c0_i32_1 = arith.constant 0 : i32
    return %c0_i32, %c0_i32_0 : i32, i32
  }
  func.func @transform_11(%arg0: i32) -> (i32, i32, i32) {
    %c0_i32 = arith.constant 0 : i32
    %c0_i32_0 = arith.constant 0 : i32
    %c0_i32_1 = arith.constant 0 : i32
    return %arg0, %c0_i32, %c0_i32_0 : i32, i32, i32
  }
}

</mosaic_0001>

<bundles_post_ra>
// kernel: tile.34
= control target key start
LH: loop header
LB: loop body
LE: loop exit
PB: predicated region body
PF: predicated region fallthrough
CT: control target
= control target key end

     0   :  { %s8_s6 = smov 3  ;;  %s11_s7 = smov 12  ;;  %vm13_vm0 = vcmask 1043458   ;;  %vm3_vm1 = vcmask 130048   ;;  %vm17_vm2 = vcmask 1048448   ;;  %vm31_vm3 = vcmask 917248   ;;  %s213_s0 = inlined_call_operand.vmem [shape: f32[2,16,16], index: 0, kind: input, shape index: {}]   ;;  %s214_s1 = inlined_call_operand.vmem [shape: f32[2,256], index: 1, kind: output, shape index: {}]  }
   0x1   :  { %v116_v0 = vld [vmem:[%s213_s0 + $0x7] ss:$16 sm:%s8_s6]   ;;  %v117_v1 = vld [vmem:[%s213_s0 - $0x11] ss:$16 sm:%s11_s7]   ;;  %s36_s12 = smov 3  ;;  %s39_s15 = smov 12 }
   0x2   :  { %v14_v2 = vsel %vm13_vm0, %v117_v1, %v116_v0  ;;  %v120_v3 = vld [vmem:[%s213_s0 + $0x5] ss:$16 sm:%s36_s12]   ;;  %s138_s16 = smov 112   ;;  %v121_v4 = vld [vmem:[%s213_s0 - $0x13] ss:$16 sm:%s39_s15]   ;;  %s22_s19 = smov 3 }
   0x3   :  { %15 = vrot.lane.b32.xlu0 %v14_v2, %s138_s16  ;;  %s25_s20 = smov 12  ;;  %v42_v5 = vsel %vm13_vm0, %v121_v4, %v120_v3  ;;  %v118_v6 = vld [vmem:[%s213_s0 + $0x6] ss:$16 sm:%s22_s19]   ;;  %s50_s25 = smov 3  ;;  %vm45_vm4 = vcmask 786048   ;;  %vm59_vm5 = vcmask 654848  }
   0x4   :  { %v119_v7 = vld [vmem:[%s213_s0 - $0x12] ss:$16 sm:%s25_s20]   ;;  %s139_s26 = smov 80   ;;  %v122_v9 = vld [vmem:[%s213_s0 + $0x4] ss:$16 sm:%s50_s25]   ;;  %s53_s29 = smov 12 }
   0x5   :  { %43 = vrot.lane.b32.xlu1 %v42_v5, %s139_s26  ;;  %v28_v8 = vsel %vm13_vm0, %v119_v7, %v118_v6  ;;  %v123_v10 = vld [vmem:[%s213_s0 - $0x14] ss:$16 sm:%s53_s29]   ;;  %s64_s3 = smov 3  ;;  %s67_s4 = smov 12  ;;  %vm73_vm6 = vcmask 523648   ;;  %vm87_vm7 = vcmask 392448  }
   0x6   :  { %s140_s5 = smov 96   ;;  %v56_v11 = vsel %vm13_vm0, %v123_v10, %v122_v9  ;;  %v124_v12 = vld [vmem:[%s213_s0 + $0x3] ss:$16 sm:%s64_s3]   ;;  %s78_s8 = smov 3  ;;  %v125_v13 = vld [vmem:[%s213_s0 - $0x15] ss:$16 sm:%s67_s4]  }
   0x7   :  { %29 = vrot.lane.b32.xlu0 %v28_v8, %s140_s5  ;;  %v126_v14 = vld [vmem:[%s213_s0 + $0x2] ss:$16 sm:%s78_s8]   ;;  %s81_s13 = smov 12  ;;  %s141_s14 = smov 64   ;;  %v70_v15 = vsel %vm13_vm0, %v125_v13, %v124_v12  ;;  %vm101_vm8 = vcmask 261248  }
   0x8   :  { %v127_v16 = vld [vmem:[%s213_s0 - $0x16] ss:$16 sm:%s81_s13]   ;;  %s92_s17 = smov 3  ;;  %s95_s18 = smov 12 }
   0x9   :  { %57 = vrot.lane.b32.xlu1 %v56_v11, %s141_s14  ;;  %v84_v17 = vsel %vm13_vm0, %v127_v16, %v126_v14  ;;  %v128_v18 = vld [vmem:[%s213_s0 + $0x1] ss:$16 sm:%s92_s17]   ;;  %s142_s23 = smov 48   ;;  %v2_v20 = vld [vmem:[%s213_s0] ss:$8 sm:$0xf]  }
   0xa   :  { %v129_v19 = vld [vmem:[%s213_s0 - $0x17] ss:$16 sm:%s95_s18]   ;;  %4 = vst.msk [vmem:[#allocation0] ss:$8 sm:$0x3] %vm3_vm1, %v2_v20   ;;  %s143_s0 = smov 32  }
   0xb   :  { %71 = vrot.lane.b32.xlu0 %v70_v15, %s142_s23  ;;  %v98_v21 = vsel %vm13_vm0, %v129_v19, %v128_v18  ;;  %6 = vst.msk [vmem:[#allocation0 - $0xf] ss:$8 sm:$0xc] %vm3_vm1, %v2_v20   ;;  %s144_s26 = smov 16  }
   0xd   :  { %85 = vrot.lane.b32.xlu1 %v84_v17, %s143_s0 }
   0xf   :  { %99 = vrot.lane.b32.xlu0 %v98_v21, %s144_s26 }
  0x75   :  { %v16_v22 = vpop.permute.xlu0 %15  }
  0x76   :  { %18 = vst.msk [vmem:[#allocation0] sm:$0x3] %vm17_vm2, %v16_v22   ;;  %20 = vst.msk [vmem:[#allocation0 + $0x6] sm:$0xc] %vm17_vm2, %v16_v22  }
  0x77   :  { %v44_v23 = vpop.permute.xlu1 %43  }
  0x79   :  { %v30_v24 = vpop.permute.xlu0 %29  }
  0x7a   :  { %32 = vst.msk [vmem:[#allocation0] sm:$0x3] %vm31_vm3, %v30_v24   ;;  %34 = vst.msk [vmem:[#allocation0 + $0x6] sm:$0xc] %vm31_vm3, %v30_v24  }
  0x7b   :  { %46 = vst.msk [vmem:[#allocation0] sm:$0x3] %vm45_vm4, %v44_v23   ;;  %48 = vst.msk [vmem:[#allocation0 + $0x6] sm:$0xc] %vm45_vm4, %v44_v23   ;;  %v58_v25 = vpop.permute.xlu1 %57  }
  0x7c   :  { %60 = vst.msk [vmem:[#allocation0] sm:$0x3] %vm59_vm5, %v58_v25   ;;  %62 = vst.msk [vmem:[#allocation0 + $0x6] sm:$0xc] %vm59_vm5, %v58_v25  }
  0x7d   :  { %v72_v26 = vpop.permute.xlu0 %71  }
  0x7e   :  { %74 = vst.msk [vmem:[#allocation0] sm:$0x3] %vm73_vm6, %v72_v26   ;;  %76 = vst.msk [vmem:[#allocation0 + $0x6] sm:$0xc] %vm73_vm6, %v72_v26  }
  0x7f   :  { %v86_v27 = vpop.permute.xlu1 %85  }
  0x80   :  { %88 = vst.msk [vmem:[#allocation0] sm:$0x3] %vm87_vm7, %v86_v27   ;;  %90 = vst.msk [vmem:[#allocation0 + $0x6] sm:$0xc] %vm87_vm7, %v86_v27  }
  0x81   :  { %v100_v28 = vpop.permute.xlu0 %99  }
  0x82   :  { %102 = vst.msk [vmem:[#allocation0] sm:$0x3] %vm101_vm8, %v100_v28   ;;  %104 = vst.msk [vmem:[#allocation0 + $0x6] sm:$0xc] %vm101_vm8, %v100_v28  }
  0x89   :  { %v108_v29 = vld [vmem:[#allocation0] sm:$0x3]  ;;  %v112_v30 = vld [vmem:[#allocation0 + $0x8] sm:$0x3] }
  0x8a   :  { %110 = vst [vmem:[%s214_s1] sm:$0x3] %v108_v29  ;;  %130 = vst [vmem:[%s214_s1 + $0x2] sm:$0x3] %v112_v30 }

// kernel: tile.38
= control target key start
LH: loop header
LB: loop body
LE: loop exit
PB: predicated region body
PF: predicated region fallthrough
CT: control target
= control target key end

     0   :  { %s28_s0 = inlined_call_operand.vmem [shape: f32[16], index: 0, kind: input, shape index: {}]   ;;  %s29_s1 = inlined_call_operand.vmem [shape: f32[16,16], index: 1, kind: output, shape index: {}]  }
   0x1   :  { %v4_v0 = vld [vmem:[%s28_s0] ss:$0 sm:$0xff] }
   0x2   :  { %5 = vst [vmem:[%s29_s1] sm:$0xff] %v4_v0  ;;  %8 = vst [vmem:[%s29_s1 + $0x8] sm:$0xff] %v4_v0 }

// kernel: tile.39
= control target key start
LH: loop header
LB: loop body
LE: loop exit
PB: predicated region body
PF: predicated region fallthrough
CT: control target
= control target key end

     0   :  { %s7_s6 = smov 3  ;;  %s21_s9 = smov 3  ;;  %vm4_vm0 = vcmask 130048   ;;  %vm11_vm1 = vcmask 1048448   ;;  %vm18_vm2 = vcmask 917248   ;;  %vm25_vm3 = vcmask 786048   ;;  %s128_s0 = inlined_call_operand.vmem [shape: f32[16,16], index: 0, kind: input, shape index: {}]   ;;  %s129_s1 = inlined_call_operand.vmem [shape: f32[1,256], index: 1, kind: output, shape index: {}]  }
   0x1   :  { %v66_v0 = vld [vmem:[%s128_s0 + $0x7] ss:$8 sm:%s7_s6]   ;;  %s81_s10 = smov 112   ;;  %v68_v1 = vld [vmem:[%s128_s0 + $0x5] ss:$8 sm:%s21_s9]   ;;  %s14_s13 = smov 3 }
   0x2   :  { %9 = vrot.lane.b32.xlu0 %v66_v0, %s81_s10  ;;  %s82_s14 = smov 80   ;;  %v67_v2 = vld [vmem:[%s128_s0 + $0x6] ss:$8 sm:%s14_s13]   ;;  %s28_s17 = smov 3  ;;  %vm32_vm4 = vcmask 654848   ;;  %vm39_vm5 = vcmask 523648  }
   0x3   :  { %23 = vrot.lane.b32.xlu1 %v68_v1, %s82_s14  ;;  %v69_v3 = vld [vmem:[%s128_s0 + $0x4] ss:$8 sm:%s28_s17]   ;;  %s35_s20 = smov 3  ;;  %s42_s21 = smov 3  ;;  %vm46_vm6 = vcmask 392448   ;;  %vm53_vm7 = vcmask 261248  }
   0x4   :  { %s83_s22 = smov 96   ;;  %s84_s23 = smov 64   ;;  %v70_v4 = vld [vmem:[%s128_s0 + $0x3] ss:$8 sm:%s35_s20]   ;;  %v71_v5 = vld [vmem:[%s128_s0 + $0x2] ss:$8 sm:%s42_s21]  }
   0x5   :  { %s2_s26 = smov 3  ;;  %s49_s29 = smov 3 }
   0x6   :  { %16 = vrot.lane.b32.xlu0 %v67_v2, %s83_s22  ;;  %v3_v6 = vld [vmem:[%s128_s0] ss:$8 sm:%s2_s26]   ;;  %s85_s3 = smov 48   ;;  %s86_s4 = smov 32  }
   0x7   :  { %30 = vrot.lane.b32.xlu1 %v69_v3, %s84_s23  ;;  %5 = vst.msk [vmem:[#allocation0] ss:$8 sm:$0x3] %vm4_vm0, %v3_v6   ;;  %v72_v7 = vld [vmem:[%s128_s0 + $0x1] ss:$8 sm:%s49_s29]   ;;  %s87_s0 = smov 16  }
   0xa   :  { %37 = vrot.lane.b32.xlu0 %v70_v4, %s85_s3 }
   0xb   :  { %44 = vrot.lane.b32.xlu1 %v71_v5, %s86_s4 }
   0xe   :  { %51 = vrot.lane.b32.xlu0 %v72_v7, %s87_s0 }
  0x74   :  { %v10_v8 = vpop.permute.xlu0 %9  }
  0x75   :  { %12 = vst.msk [vmem:[#allocation0] ss:$8 sm:$0x3] %vm11_vm1, %v10_v8   ;;  %v24_v9 = vpop.permute.xlu1 %23  }
  0x78   :  { %v17_v10 = vpop.permute.xlu0 %16  }
  0x79   :  { %19 = vst.msk [vmem:[#allocation0] ss:$8 sm:$0x3] %vm18_vm2, %v17_v10   ;;  %v31_v11 = vpop.permute.xlu1 %30  }
  0x7a   :  { %26 = vst.msk [vmem:[#allocation0] ss:$8 sm:$0x3] %vm25_vm3, %v24_v9  }
  0x7b   :  { %33 = vst.msk [vmem:[#allocation0] ss:$8 sm:$0x3] %vm32_vm4, %v31_v11  }
  0x7c   :  { %v38_v12 = vpop.permute.xlu0 %37  }
  0x7d   :  { %40 = vst.msk [vmem:[#allocation0] ss:$8 sm:$0x3] %vm39_vm5, %v38_v12   ;;  %v45_v13 = vpop.permute.xlu1 %44  }
  0x7e   :  { %47 = vst.msk [vmem:[#allocation0] ss:$8 sm:$0x3] %vm46_vm6, %v45_v13  }
  0x80   :  { %v52_v14 = vpop.permute.xlu0 %51  }
  0x81   :  { %54 = vst.msk [vmem:[#allocation0] ss:$8 sm:$0x3] %vm53_vm7, %v52_v14  }
  0x88   :  { %v58_v15 = vld [vmem:[#allocation0] sm:$0x1]  ;;  %v62_v16 = vld [vmem:[#allocation0 + $0x8] sm:$0x1] }
  0x89   :  { %60 = vst [vmem:[%s129_s1] sm:$0x1] %v58_v15  ;;  %73 = vst [vmem:[%s129_s1 + $0x1] sm:$0x1] %v62_v16 }

// kernel: bottleneck_block_forward.1
= control target key start
LH: loop header
LB: loop body
LE: loop exit
PB: predicated region body
PF: predicated region fallthrough
CT: control target
= control target key end

     0   :  { %vm117_vm0 = vcmask 1041409   ;;  %vm196_vm1 = vcmask 64512   ;;  %vm3816_vm5 = vmmov 1   ;;  %s5244_s9 = inlined_call_operand.vmem [shape: f32[256,8], index: 9, kind: input, shape index: {}]   ;;  %s5245_s0 = inlined_call_operand.vmem [shape: f32[2,16,256], index: 0, kind: input, shape index: {}]   ;;  %s5246_s10 = inlined_call_operand.vmem [shape: f32[8,256], index: 10, kind: input, shape index: {}]   ;;  %s5247_s6 = inlined_call_operand.vmem [shape: bf16[768,256], index: 6, kind: input, shape index: {}]   ;;  %s5248_s2 = inlined_call_operand.vmem [shape: f32[1,256], index: 2, kind: input, shape index: {}]   ;;  %s5249_s3 = inlined_call_operand.vmem [shape: f32[1,256], index: 3, kind: input, shape index: {}]   ;;  %s5250_s1 = inlined_call_operand.vmem [shape: f32[2,256], index: 1, kind: input, shape index: {}]   ;;  %s5251_s7 = inlined_call_operand.vmem [shape: bf16[768,256], index: 7, kind: input, shape index: {}]   ;;  %s5252_s4 = inlined_call_operand.vmem [shape: f32[1,256], index: 4, kind: input, shape index: {}]   ;;  %s5253_s5 = inlined_call_operand.vmem [shape: f32[1,256], index: 5, kind: input, shape index: {}]   ;;  %s5254_s8 = inlined_call_operand.vmem [shape: f32[1,256], index: 8, kind: input, shape index: {}]   ;;  %s5255_s11 = inlined_call_operand.vmem [shape: f32[2,16,256], index: 11, kind: output, shape index: {}]  }
   0x1   :  { %v97_v0 = vld [vmem:[%s5244_s9 + $0x80] sm:$0xff]  ;;  %v98_v1 = vld [vmem:[%s5244_s9 + $0x88] sm:$0xff]  ;;  %v99_v5 = vld [vmem:[%s5244_s9 + $0x90] sm:$0xff] }
   0x2   :  { %v81_v2 = vld [vmem:[%s5244_s9] sm:$0xff]  ;;  %v3886_v3 = vpack.c.bf16 %v98_v1, %v97_v0  ;;  %v82_v4 = vld [vmem:[%s5244_s9 + $0x8] sm:$0xff]  ;;  %v100_v6 = vld [vmem:[%s5244_s9 + $0x98] sm:$0xff] }
   0x3   :  { %v3897_v7 = vpack.c.bf16 %v82_v4, %v81_v2  ;;  %v3899_v8 = vpack.c.bf16 %v100_v6, %v99_v5  ;;  %v83_v9 = vld [vmem:[%s5244_s9 + $0x10] sm:$0xff]  ;;  %v84_v10 = vld [vmem:[%s5244_s9 + $0x18] sm:$0xff]  ;;  %v101_v11 = vld [vmem:[%s5244_s9 + $0xa0] sm:$0xff] }
   0x4   :  { %3294 = vmatprep.subr.bf16.mxu1 %v3886_v3  ;;  %v102_v12 = vld [vmem:[%s5244_s9 + $0xa8] sm:$0xff]  ;;  %3358 = vmatprep.subr.bf16.mxu0 %v3886_v3  ;;  %v3916_v13 = vpack.c.bf16 %v84_v10, %v83_v9  ;;  %v85_v15 = vld [vmem:[%s5244_s9 + $0x20] sm:$0xff]  ;;  %v103_v17 = vld [vmem:[%s5244_s9 + $0xb0] sm:$0xff] }
   0x5   :  { %3296 = vmatpush3.bf16.msra.mxu1 %v3897_v7  ;;  %3360 = vmatpush3.bf16.msra.mxu0 %v3897_v7  ;;  %v3920_v14 = vpack.c.bf16 %v102_v12, %v101_v11  ;;  %v86_v16 = vld [vmem:[%s5244_s9 + $0x28] sm:$0xff]  ;;  %v104_v18 = vld [vmem:[%s5244_s9 + $0xb8] sm:$0xff]  ;;  %v87_v21 = vld [vmem:[%s5244_s9 + $0x30] sm:$0xff] }
   0x6   :  { %3298 = vmatprep.subr.bf16.mxu1 %v3899_v8  ;;  %3362 = vmatprep.subr.bf16.mxu0 %v3899_v8  ;;  %v3936_v19 = vpack.c.bf16 %v86_v16, %v85_v15  ;;  %v3940_v20 = vpack.c.bf16 %v104_v18, %v103_v17  ;;  %v88_v22 = vld [vmem:[%s5244_s9 + $0x38] sm:$0xff]  ;;  %v105_v23 = vld [vmem:[%s5244_s9 + $0xc0] sm:$0xff]  ;;  %v106_v24 = vld [vmem:[%s5244_s9 + $0xc8] sm:$0xff] }
   0x7   :  { %v3958_v25 = vld [vmem:[%s5245_s0 + $0x8] sm:$0xff]  ;;  %v3963_v26 = vld [vmem:[%s5245_s0 + $0x18] sm:$0xff]  ;;  %v3976_v29 = vpack.c.bf16 %v88_v22, %v87_v21  ;;  %v3985_v32 = vld [vmem:[%s5245_s0] sm:$0xff]  ;;  %v3999_v35 = vpack.c.bf16 %v106_v24, %v105_v23 }
   0x8   :  { %v3968_v27 = vld [vmem:[%s5245_s0 + $0x28] sm:$0xff]  ;;  %v3973_v28 = vld [vmem:[%s5245_s0 + $0x38] sm:$0xff]  ;;  %v60_v30 = vadd.f32 %v3963_v26, %v3958_v25  ;;  %v3990_v33 = vld [vmem:[%s5245_s0 + $0x10] sm:$0xff] }
   0x9   :  { %3300 = vmatpush3.bf16.msra.mxu1 %v3916_v13  ;;  %3364 = vmatpush3.bf16.msra.mxu0 %v3916_v13  ;;  %v74_v31 = vadd.f32 %v3973_v28, %v3968_v27  ;;  %v3995_v34 = vld [vmem:[%s5245_s0 + $0x20] sm:$0xff]  ;;  %v90_v37 = vld [vmem:[%s5244_s9 + $0x48] sm:$0xff]  ;;  %v4010_v38 = vld [vmem:[%s5245_s0 + $0x30] sm:$0xff]  ;;  %v53_v39 = vadd.f32 %v3990_v33, %v3985_v32 }
   0xa   :  { %3302 = vmatprep.subr.bf16.mxu1 %v3920_v14  ;;  %3366 = vmatprep.subr.bf16.mxu0 %v3920_v14  ;;  %v89_v36 = vld [vmem:[%s5244_s9 + $0x40] sm:$0xff]  ;;  %v107_v40 = vld [vmem:[%s5244_s9 + $0xd0] sm:$0xff]  ;;  %v108_v41 = vld [vmem:[%s5244_s9 + $0xd8] sm:$0xff]  ;;  %v61_v42 = vrot.slane %v60_v30, 4  ;;  %v67_v44 = vadd.f32 %v4010_v38, %v3995_v34 }
   0xb   :  { %v75_v43 = vrot.slane %v74_v31, 4  ;;  %v54_v45 = vrot.slane %v53_v39, 4  ;;  %v4024_v46 = vpack.c.bf16 %v90_v37, %v89_v36  ;;  %v4028_v50 = vpack.c.bf16 %v108_v41, %v107_v40  ;;  %v91_v51 = vld [vmem:[%s5244_s9 + $0x50] sm:$0xff]  ;;  %v92_v52 = vld [vmem:[%s5244_s9 + $0x58] sm:$0xff]  ;;  %v109_v54 = vld [vmem:[%s5244_s9 + $0xe0] sm:$0xff] }
   0xc   :  { %v62_v47 = vadd.f32 %v61_v42, %v60_v30  ;;  %v68_v49 = vrot.slane %v67_v44, 4  ;;  %v110_v55 = vld [vmem:[%s5244_s9 + $0xe8] sm:$0xff]  ;;  %v4044_v60 = vpack.c.bf16 %v92_v52, %v91_v51  ;;  %v93_v61 = vld [vmem:[%s5244_s9 + $0x60] sm:$0xff]  ;;  %v111_v5 = vld [vmem:[%s5244_s9 + $0xf0] sm:$0xff]  ;;  %v3814_v41 = vmov 0.0  }
   0xd   :  { %3304 = vmatpush3.bf16.msra.mxu1 %v3936_v19  ;;  %3368 = vmatpush3.bf16.msra.mxu0 %v3936_v19  ;;  %v76_v48 = vadd.f32 %v75_v43, %v74_v31  ;;  %v55_v53 = vadd.f32 %v54_v45, %v53_v39  ;;  %v94_v62 = vld [vmem:[%s5244_s9 + $0x68] sm:$0xff]  ;;  %v4054_v2 = vpack.c.bf16 %v110_v55, %v109_v54  ;;  %v112_v6 = vld [vmem:[%s5244_s9 + $0xf8] sm:$0xff]  ;;  %v95_v22 = vld [vmem:[%s5244_s9 + $0x70] sm:$0xff] }
   0xe   :  { %3306 = vmatprep.subr.bf16.mxu1 %v3940_v20  ;;  %3370 = vmatprep.subr.bf16.mxu0 %v3940_v20  ;;  %v63_v56 = vrot.slane %v62_v47, 2  ;;  %v69_v58 = vadd.f32 %v68_v49, %v67_v44  ;;  %v4063_v12 = vpack.c.bf16 %v94_v62, %v93_v61  ;;  %v4068_v21 = vpack.c.bf16 %v112_v6, %v111_v5  ;;  %v96_v23 = vld [vmem:[%s5244_s9 + $0x78] sm:$0xff]  ;;  %v195_v39 = vld [vmem:[%s5246_s10 + $0x8] sm:$0xff]  ;;  %v4093_v40 = vld [vmem:[%s5246_s10] sm:$0xff] }
   0xf   :  { %v77_v57 = vrot.slane %v76_v48, 2  ;;  %v56_v59 = vrot.slane %v55_v53, 2  ;;  %v4079_v30 = vpack.c.bf16 %v96_v23, %v95_v22 }
  0x10   :  { %v64_v63 = vadd.f32 %v63_v56, %v62_v47  ;;  %v70_v1 = vrot.slane %v69_v58, 2  ;;  %v38_v47 = vlaneseq }
  0x11   :  { %3308 = vmatpush3.bf16.msra.mxu1 %v3976_v29  ;;  %3372 = vmatpush3.bf16.msra.mxu0 %v3976_v29  ;;  %v78_v0 = vadd.f32 %v77_v57, %v76_v48  ;;  %v57_v4 = vadd.f32 %v56_v59, %v55_v53  ;;  %v3815_v48 = vmov 1966171168  }
  0x12   :  { %3310 = vmatprep.subr.bf16.mxu1 %v3999_v35  ;;  %3374 = vmatprep.subr.bf16.mxu0 %v3999_v35  ;;  %v65_v9 = vrot.slane %v64_v63, 1  ;;  %v71_v11 = vadd.f32 %v70_v1, %v69_v58  ;;  %v275_v49 = vunpack.c.l.s4 %v3815_v48  ;;  %v4114_v51 = vshrl.u32 %v38_v47, 7 }
  0x13   :  { %v79_v10 = vrot.slane %v78_v0, 1  ;;  %v58_v17 = vrot.slane %v57_v4, 1 }
  0x14   :  { %v66_v15 = vadd.f32 %v65_v9, %v64_v63  ;;  %v72_v18 = vrot.slane %v71_v11, 1  ;;  %v276_v52 = vunpack.c.0.s8 %v275_v49  ;;  %v4121_v58 = vsub.s32 0, %v4114_v51 }
  0x15   :  { %3312 = vmatpush3.bf16.msra.mxu1 %v4024_v46  ;;  %3376 = vmatpush3.bf16.msra.mxu0 %v4024_v46  ;;  %v80_v16 = vadd.f32 %v79_v10, %v78_v0  ;;  %v59_v31 = vadd.f32 %v58_v17, %v57_v4  ;;  %v4124_v59 = vsub.s32 1, %v4114_v51  ;;  %vm701_vm2 = vcmp.lt.s32.totalorder %v4114_v51, 7 }
  0x16   :  { %3314 = vmatprep.subr.bf16.mxu1 %v4028_v50  ;;  %3378 = vmatprep.subr.bf16.mxu0 %v4028_v50  ;;  %v73_v36 = vadd.f32 %v72_v18, %v71_v11  ;;  %v4117_v54 = vsub.s32 %v276_v52, %v4114_v51  ;;  %vm668_vm3 = vcmp.lt.s32.totalorder %v4114_v51, 1  ;;  %vm41_vm4 = vcmp.ne.s32.totalorder %v4114_v51, 0 }
  0x17   :  { %v119_v24 = vsel %vm117_vm0, %v80_v16, %v66_v15  ;;  %vm4394_vm6 = vmpackc.low %vm3816_vm5, %vm41_vm4 }
  0x18   :  { %186 = vmatprep.mubr.f32.mxu1 %v119_v24  ;;  %v118_v37 = vsel %vm117_vm0, %v73_v36, %v59_v31 }
  0x19   :  { %3316 = vmatpush3.bf16.msra.mxu1 %v4044_v60  ;;  %3380 = vmatpush3.bf16.msra.mxu0 %v4044_v60 }
  0x1a   :  { %3318 = vmatprep.subr.bf16.mxu1 %v4054_v2  ;;  %3382 = vmatprep.subr.bf16.mxu0 %v4054_v2 }
  0x1d   :  { %3320 = vmatpush3.bf16.msra.mxu1 %v4063_v12  ;;  %3384 = vmatpush3.bf16.msra.mxu0 %v4063_v12 }
  0x1e   :  { %3322 = vmatprep.subr.bf16.mxu1 %v4068_v21  ;;  %3386 = vmatprep.subr.bf16.mxu0 %v4068_v21 }
  0x21   :  { %3324 = vmatpush3.bf16.msra.mxu1 %v4079_v30  ;;  %3388 = vmatpush3.bf16.msra.mxu0 %v4079_v30 }
  0x22   :  { %200 = vmatprep.subr.mxu1 %v195_v39  ;;  %1617 = vmatprep.subr.mxu0 %v195_v39 }
  0x24   :  { %187 = vmatmul.mubr.f32.vlgmr.msra.gmra.mrb[0].mxu1 %v118_v37 }
  0x25   :  { %201 = vmatpush1.msra.mxu1 %v4093_v40  ;;  %264 = vmatprep.mubr.f32.mxu1 %v3814_v41 }
  0x26   :  { %3326 = vmatprep.subr.bf16.mxu1 %v3886_v3 }
  0xf7   :  { %v3185_v42 = vpop.f32.mrb[0].mxu1 }
  0xf8   :  { %v3186_v43 = vpop.f32.mrb[1].mxu1 }
  0xf9   :  { %v3187_v44 = vadd.f32 %v3186_v43, %v3185_v42 }
  0xfb   :  { %v193_v45 = vmul.f32 0.001953125, %v3187_v44 }
  0xfd   :  { %2908 = vmatmul.mubr.msk.f32.vlgmr.msra.gmra.mrb[2].mxu1 %vm196_vm1, %v193_v45 }
  0xfe   :  { %3328 = vmatpush3.bf16.msra.mxu1 %v3897_v7 }
  0xff   :  { %3330 = vmatprep.subr.bf16.mxu1 %v3899_v8 }
 0x102   :  { %3332 = vmatpush3.bf16.msra.mxu1 %v3916_v13 }
 0x103   :  { %3334 = vmatprep.subr.bf16.mxu1 %v3920_v14 }
 0x106   :  { %3336 = vmatpush3.bf16.msra.mxu1 %v3936_v19 }
 0x107   :  { %3338 = vmatprep.subr.bf16.mxu1 %v3940_v20 }
 0x10a   :  { %3340 = vmatpush3.bf16.msra.mxu1 %v3976_v29 }
 0x10b   :  { %3342 = vmatprep.subr.bf16.mxu1 %v3999_v35 }
 0x10e   :  { %3344 = vmatpush3.bf16.msra.mxu1 %v4024_v46 }
 0x10f   :  { %3346 = vmatprep.subr.bf16.mxu1 %v4028_v50 }
 0x112   :  { %3348 = vmatpush3.bf16.msra.mxu1 %v4044_v60 }
 0x113   :  { %3350 = vmatprep.subr.bf16.mxu1 %v4054_v2 }
 0x116   :  { %3352 = vmatpush3.bf16.msra.mxu1 %v4063_v12 }
 0x117   :  { %3354 = vmatprep.subr.bf16.mxu1 %v4068_v21 }
 0x11a   :  { %3356 = vmatpush3.bf16.msra.mxu1 %v4079_v30 }
 0x11b   :  { %444 = vmatprep.subr.mxu1 %v195_v39 }
 0x1d0   :  { %v266_v53 = vpop.f32.mrb[2].mxu1 }
 0x1d1   :  { %v268_v55 = vpop.f32.mrb[3].mxu1 }
 0x1d2   :  { %v273_v56 = vcombine.low %v266_v53, %v268_v55 }
 0x1d4   :  { %v280_v57 = vrot.slane %v273_v56, %v4117_v54 }
 0x1d6   :  { %v281_v61 = vcombine.high %v280_v57, %v280_v57  ;;  %v288_v62 = vrot.slane %v280_v57, %v4117_v54 }
 0x1d8   :  { %v295_v63 = vrot.slane %v281_v61, %v4117_v54  ;;  %v299_v0 = vrot.slane %v288_v62, %v4121_v58  ;;  %v303_v1 = vrot.slane %v288_v62, %v4124_v59 }
 0x1da   :  { %v307_v4 = vrot.slane %v295_v63, %v4121_v58  ;;  %v311_v5 = vrot.slane %v295_v63, %v4124_v59  ;;  %v4133_v6 = vsub.f32 %v3985_v32, %v299_v0  ;;  %v4136_v9 = vsub.f32 %v3958_v25, %v303_v1 }
 0x1db   :  { %v4139_v10 = vsub.f32 %v3990_v33, %v299_v0  ;;  %v4142_v11 = vsub.f32 %v3963_v26, %v303_v1 }
 0x1dc   :  { %v4145_v15 = vsub.f32 %v3995_v34, %v307_v4  ;;  %v4148_v16 = vsub.f32 %v3968_v27, %v311_v5  ;;  %v4151_v17 = vsub.f32 %v4010_v38, %v307_v4  ;;  %v4154_v32 = vsub.f32 %v3973_v28, %v311_v5 }
 0x1dd   :  { %v324_v25 = vmul.f32 %v4133_v6, %v4133_v6  ;;  %v325_v33 = vmul.f32 %v4136_v9, %v4136_v9  ;;  %v326_v26 = vmul.f32 %v4139_v10, %v4139_v10  ;;  %v327_v34 = vmul.f32 %v4142_v11, %v4142_v11 }
 0x1de   :  { %v328_v27 = vmul.f32 %v4145_v15, %v4145_v15  ;;  %v329_v38 = vmul.f32 %v4148_v16, %v4148_v16  ;;  %v330_v28 = vmul.f32 %v4151_v17, %v4151_v17  ;;  %v331_v18 = vmul.f32 %v4154_v32, %v4154_v32 }
 0x1df   :  { %v332_v22 = vadd.f32 %v326_v26, %v324_v25  ;;  %v339_v23 = vadd.f32 %v327_v34, %v325_v33 }
 0x1e0   :  { %v353_v24 = vadd.f32 %v331_v18, %v329_v38  ;;  %v346_v31 = vadd.f32 %v330_v28, %v328_v27  ;;  %v3458_v27 = vld [vmem:[%s5247_s6 + $0x104] ss:$8 sps:$4 sm:$0xff]  }
 0x1e1   :  { %v340_v36 = vrot.slane %v339_v23, 4  ;;  %v333_v37 = vrot.slane %v332_v22, 4 }
 0x1e2   :  { %v354_v39 = vrot.slane %v353_v24, 4  ;;  %v347_v42 = vrot.slane %v346_v31, 4 }
 0x1e3   :  { %v341_v43 = vadd.f32 %v340_v36, %v339_v23  ;;  %v334_v44 = vadd.f32 %v333_v37, %v332_v22  ;;  %v3459_v36 = vld [vmem:[%s5247_s6 + $0x110] ss:$8 sps:$4 sm:$0xff]   ;;  %v3464_v37 = vld [vmem:[%s5247_s6 + $0x124] ss:$8 sps:$4 sm:$0xff]  }
 0x1e4   :  { %v355_v45 = vadd.f32 %v354_v39, %v353_v24  ;;  %v348_v47 = vadd.f32 %v347_v42, %v346_v31  ;;  %v3456_v24 = vld [vmem:[%s5247_s6 + $0x100] ss:$8 sps:$4 sm:$0xff]   ;;  %v3467_v42 = vld [vmem:[%s5247_s6 + $0x134] ss:$8 sps:$4 sm:$0xff]  }
 0x1e5   :  { %v342_v48 = vrot.slane %v341_v43, 2  ;;  %v335_v49 = vrot.slane %v334_v44, 2  ;;  %v3462_v39 = vld [vmem:[%s5247_s6 + $0x120] ss:$8 sps:$4 sm:$0xff]  }
 0x1e6   :  { %v356_v52 = vrot.slane %v355_v45, 2  ;;  %v349_v53 = vrot.slane %v348_v47, 2 }
 0x1e7   :  { %v343_v55 = vadd.f32 %v342_v48, %v341_v43  ;;  %v336_v56 = vadd.f32 %v335_v49, %v334_v44  ;;  %v3465_v43 = vld [vmem:[%s5247_s6 + $0x130] ss:$8 sps:$4 sm:$0xff]   ;;  %v3470_v44 = vld [vmem:[%s5247_s6 + $0x144] ss:$8 sps:$4 sm:$0xff]  }
 0x1e8   :  { %v357_v57 = vadd.f32 %v356_v52, %v355_v45  ;;  %v350_v61 = vadd.f32 %v349_v53, %v348_v47  ;;  %v3468_v45 = vld [vmem:[%s5247_s6 + $0x140] ss:$8 sps:$4 sm:$0xff]   ;;  %v3473_v47 = vld [vmem:[%s5247_s6 + $0x154] ss:$8 sps:$4 sm:$0xff]   ;;  %v3471_v48 = vld [vmem:[%s5247_s6 + $0x150] ss:$8 sps:$4 sm:$0xff]  }
 0x1e9   :  { %v344_v62 = vrot.slane %v343_v55, 1  ;;  %v337_v63 = vrot.slane %v336_v56, 1  ;;  %v3476_v49 = vld [vmem:[%s5247_s6 + $0x164] ss:$8 sps:$4 sm:$0xff]   ;;  %v3474_v52 = vld [vmem:[%s5247_s6 + $0x160] ss:$8 sps:$4 sm:$0xff]  }
 0x1ea   :  { %v358_v0 = vrot.slane %v357_v57, 1  ;;  %v351_v1 = vrot.slane %v350_v61, 1  ;;  %v3479_v53 = vld [vmem:[%s5247_s6 + $0x174] ss:$8 sps:$4 sm:$0xff]  }
 0x1eb   :  { %v345_v4 = vadd.f32 %v344_v62, %v343_v55  ;;  %v338_v25 = vadd.f32 %v337_v63, %v336_v56  ;;  %v3477_v55 = vld [vmem:[%s5247_s6 + $0x170] ss:$8 sps:$4 sm:$0xff]   ;;  %v3482_v56 = vld [vmem:[%s5247_s6 + $0x184] ss:$8 sps:$4 sm:$0xff]  }
 0x1ec   :  { %v359_v5 = vadd.f32 %v358_v0, %v357_v57  ;;  %v352_v33 = vadd.f32 %v351_v1, %v350_v61  ;;  %v3480_v57 = vld [vmem:[%s5247_s6 + $0x180] ss:$8 sps:$4 sm:$0xff]   ;;  %v3485_v61 = vld [vmem:[%s5247_s6 + $0x194] ss:$8 sps:$4 sm:$0xff]   ;;  %v3483_v62 = vld [vmem:[%s5247_s6 + $0x190] ss:$8 sps:$4 sm:$0xff]  }
 0x1ed   :  { %v3488_v63 = vld [vmem:[%s5247_s6 + $0x1a4] ss:$8 sps:$4 sm:$0xff]   ;;  %v3486_v0 = vld [vmem:[%s5247_s6 + $0x1a0] ss:$8 sps:$4 sm:$0xff]   ;;  %v3491_v1 = vld [vmem:[%s5247_s6 + $0x1b4] ss:$8 sps:$4 sm:$0xff]  }
 0x1ee   :  { %v365_v26 = vsel %vm117_vm0, %v359_v5, %v345_v4  ;;  %v364_v34 = vsel %vm117_vm0, %v352_v33, %v338_v25  ;;  %v3489_v4 = vld [vmem:[%s5247_s6 + $0x1b0] ss:$8 sps:$4 sm:$0xff]   ;;  %v3494_v5 = vld [vmem:[%s5247_s6 + $0x1c4] ss:$8 sps:$4 sm:$0xff]   ;;  %v3492_v25 = vld [vmem:[%s5247_s6 + $0x1c0] ss:$8 sps:$4 sm:$0xff]  }
 0x1ef   :  { %432 = vmatprep.mubr.f32.mxu1 %v365_v26  ;;  %v3495_v33 = vld [vmem:[%s5247_s6 + $0x1d0] ss:$8 sps:$4 sm:$0xff]   ;;  %v3497_v26 = vld [vmem:[%s5247_s6 + $0x1d4] ss:$8 sps:$4 sm:$0xff]  }
 0x1f0   :  { %433 = vmatmul.mubr.f32.vlgmr.msra.gmra.mrb[4].mxu1 %v364_v34  ;;  %v3500_v34 = vld [vmem:[%s5247_s6 + $0x1e4] ss:$8 sps:$4 sm:$0xff]  }
 0x1f1   :  { %445 = vmatpush1.msra.mxu1 %v4093_v40  ;;  %508 = vmatprep.mubr.f32.mxu1 %v3814_v41  ;;  %v3461_v40 = vld [vmem:[%s5247_s6 + $0x114] ss:$8 sps:$4 sm:$0xff]  }
 0x1f2   :  { %950 = vmatprep.subr.bf16.mxu1 %v3458_v27  ;;  %v3498_v27 = vld [vmem:[%s5247_s6 + $0x1e0] ss:$8 sps:$4 sm:$0xff]  }
 0x2c3   :  { %v3220_v38 = vpop.f32.mrb[4].mxu1 }
 0x2c4   :  { %v3221_v28 = vpop.f32.mrb[5].mxu1 }
 0x2c5   :  { %v3222_v18 = vadd.f32 %v3221_v28, %v3220_v38  ;;  %v3503_v38 = vld [vmem:[%s5247_s6 + $0x1f4] ss:$8 sps:$4 sm:$0xff]   ;;  %v3501_v28 = vld [vmem:[%s5247_s6 + $0x1f0] ss:$8 sps:$4 sm:$0xff]  }
 0x2c7   :  { %v438_v22 = vmul.f32 0.001953125, %v3222_v18  ;;  %v3506_v18 = vld [vmem:[%s5247_s6 + $0x4] ss:$8 sps:$4 sm:$0xff]  }
 0x2c9   :  { %v439_v23 = vadd.f32 1e-05, %v438_v22 }
 0x2cb   :  { %3744 = vrsqrt.f32 %v439_v23 }
 0x2d5   :  { %v3745_v31 = vpop.eup %3744 }
 0x2d6   :  { %2909 = vmatmul.mubr.msk.f32.vlgmr.msra.gmra.mrb[6].mxu1 %vm196_vm1, %v3745_v31 }
 0x2d7   :  { %951 = vmatpush1.bf16.msra.mxu1 %v3456_v24 }
 0x2d8   :  { %952 = vmatprep.subr.bf16.mxu1 %v3461_v40 }
 0x2db   :  { %953 = vmatpush1.bf16.msra.mxu1 %v3459_v36 }
 0x2dc   :  { %954 = vmatprep.subr.bf16.mxu1 %v3464_v37  ;;  %v568_v37 = vld [vmem:[%s5248_s2] sm:$0x3] }
 0x2df   :  { %955 = vmatpush1.bf16.msra.mxu1 %v3462_v39 }
 0x2e0   :  { %956 = vmatprep.subr.bf16.mxu1 %v3467_v42 }
 0x2e3   :  { %957 = vmatpush1.bf16.msra.mxu1 %v3465_v43 }
 0x2e4   :  { %958 = vmatprep.subr.bf16.mxu1 %v3470_v44  ;;  %v588_v44 = vld [vmem:[%s5249_s3] sm:$0x3] }
 0x2e7   :  { %959 = vmatpush1.bf16.msra.mxu1 %v3468_v45  ;;  %v573_v45 = vrot.slane %v568_v37, %v4121_v58 }
 0x2e8   :  { %960 = vmatprep.subr.bf16.mxu1 %v3473_v47  ;;  %v577_v47 = vrot.slane %v568_v37, %v4124_v59 }
 0x2eb   :  { %961 = vmatpush1.bf16.msra.mxu1 %v3471_v48 }
 0x2ec   :  { %962 = vmatprep.subr.bf16.mxu1 %v3476_v49 }
 0x2ef   :  { %963 = vmatpush1.bf16.msra.mxu1 %v3474_v52 }
 0x2f0   :  { %964 = vmatprep.subr.bf16.mxu1 %v3479_v53 }
 0x2f3   :  { %965 = vmatpush1.bf16.msra.mxu1 %v3477_v55 }
 0x2f4   :  { %966 = vmatprep.subr.bf16.mxu1 %v3482_v56 }
 0x2f7   :  { %967 = vmatpush1.bf16.msra.mxu1 %v3480_v57  ;;  %v593_v57 = vrot.slane %v588_v44, %v4121_v58 }
 0x2f8   :  { %968 = vmatprep.subr.bf16.mxu1 %v3485_v61  ;;  %v597_v61 = vrot.slane %v588_v44, %v4124_v59 }
 0x2fb   :  { %969 = vmatpush1.bf16.msra.mxu1 %v3483_v62 }
 0x2fc   :  { %970 = vmatprep.subr.bf16.mxu1 %v3488_v63 }
 0x2ff   :  { %971 = vmatpush1.bf16.msra.mxu1 %v3486_v0 }
 0x300   :  { %972 = vmatprep.subr.bf16.mxu1 %v3491_v1 }
 0x303   :  { %973 = vmatpush1.bf16.msra.mxu1 %v3489_v4 }
 0x304   :  { %974 = vmatprep.subr.bf16.mxu1 %v3494_v5 }
 0x307   :  { %975 = vmatpush1.bf16.msra.mxu1 %v3492_v25 }
 0x308   :  { %976 = vmatprep.subr.bf16.mxu1 %v3497_v26 }
 0x30b   :  { %977 = vmatpush1.bf16.msra.mxu1 %v3495_v33 }
 0x30c   :  { %978 = vmatprep.subr.bf16.mxu1 %v3500_v34 }
 0x30f   :  { %979 = vmatpush1.bf16.msra.mxu1 %v3498_v27 }
 0x310   :  { %980 = vmatprep.subr.bf16.mxu1 %v3503_v38 }
 0x313   :  { %981 = vmatpush1.bf16.msra.mxu1 %v3501_v28 }
 0x314   :  { %1163 = vmatprep.subr.bf16.mxu1 %v3506_v18 }
 0x3a9   :  { %v510_v22 = vpop.f32.mrb[6].mxu1 }
 0x3aa   :  { %v512_v23 = vpop.f32.mrb[7].mxu1 }
 0x3ab   :  { %v517_v24 = vcombine.low %v510_v22, %v512_v23 }
 0x3ad   :  { %v524_v40 = vrot.slane %v517_v24, %v4117_v54 }
 0x3af   :  { %v525_v31 = vcombine.high %v524_v40, %v524_v40  ;;  %v532_v36 = vrot.slane %v524_v40, %v4117_v54 }
 0x3b1   :  { %v539_v39 = vrot.slane %v525_v31, %v4117_v54  ;;  %v543_v42 = vrot.slane %v532_v36, %v4121_v58  ;;  %v547_v43 = vrot.slane %v532_v36, %v4124_v59 }
 0x3b3   :  { %v551_v48 = vrot.slane %v539_v39, %v4121_v58  ;;  %v555_v49 = vrot.slane %v539_v39, %v4124_v59  ;;  %v560_v52 = vmul.f32 %v543_v42, %v4133_v6  ;;  %v561_v53 = vmul.f32 %v547_v43, %v4136_v9 }
 0x3b4   :  { %v562_v55 = vmul.f32 %v543_v42, %v4139_v10  ;;  %v563_v56 = vmul.f32 %v547_v43, %v4142_v11 }
 0x3b5   :  { %v564_v62 = vmul.f32 %v551_v48, %v4145_v15  ;;  %v565_v63 = vmul.f32 %v555_v49, %v4148_v16  ;;  %v566_v0 = vmul.f32 %v551_v48, %v4151_v17  ;;  %v567_v1 = vmul.f32 %v555_v49, %v4154_v32 }
 0x3b6   :  { %v580_v4 = vmul.f32 %v573_v45, %v560_v52  ;;  %v581_v6 = vmul.f32 %v577_v47, %v561_v53  ;;  %v582_v5 = vmul.f32 %v573_v45, %v562_v55  ;;  %v583_v9 = vmul.f32 %v577_v47, %v563_v56 }
 0x3b7   :  { %v585_v25 = vmul.f32 %v577_v47, %v565_v63  ;;  %v587_v10 = vmul.f32 %v577_v47, %v567_v1  ;;  %v584_v33 = vmul.f32 %v573_v45, %v564_v62  ;;  %v586_v11 = vmul.f32 %v573_v45, %v566_v0 }
 0x3b8   :  { %v600_v26 = vadd.f32 %v593_v57, %v580_v4  ;;  %v602_v34 = vadd.f32 %v593_v57, %v582_v5  ;;  %v601_v27 = vadd.f32 %v597_v61, %v581_v6  ;;  %v603_v38 = vadd.f32 %v597_v61, %v583_v9 }
 0x3b9   :  { %v4301_v28 = vadd.f32 %v597_v61, %v585_v25  ;;  %v4303_v15 = vadd.f32 %v597_v61, %v587_v10  ;;  %v4305_v16 = vadd.f32 %v593_v57, %v584_v33  ;;  %v4307_v17 = vadd.f32 %v593_v57, %v586_v11 }
 0x3ba   :  { %v608_v32 = vsub.f32 0.0, %v600_v26  ;;  %v610_v18 = vsub.f32 0.0, %v602_v34  ;;  %v609_v22 = vsub.f32 0.0, %v601_v27  ;;  %v611_v23 = vsub.f32 0.0, %v603_v38 }
 0x3bb   :  { %v613_v24 = vsub.f32 0.0, %v4301_v28  ;;  %v615_v40 = vsub.f32 0.0, %v4303_v15  ;;  %v612_v31 = vsub.f32 0.0, %v4305_v16  ;;  %v614_v43 = vsub.f32 0.0, %v4307_v17 }
 0x3bc   :  { %v616_v36 = vmul.f32 1.442695, %v608_v32  ;;  %v620_v37 = vmul.f32 1.442695, %v610_v18  ;;  %v618_v39 = vmul.f32 1.442695, %v609_v22 }
 0x3bd   :  { %v622_v42 = vmul.f32 1.442695, %v611_v23  ;;  %v626_v44 = vmul.f32 1.442695, %v613_v24  ;;  %v630_v45 = vmul.f32 1.442695, %v615_v40 }
 0x3be   :  { %3746 = vpow2.f32 %v616_v36  ;;  %v624_v47 = vmul.f32 1.442695, %v612_v31  ;;  %v628_v48 = vmul.f32 1.442695, %v614_v43 }
 0x3bf   :  { %3748 = vpow2.f32 %v620_v37 }
 0x3c0   :  { %3750 = vpow2.f32 %v618_v39 }
 0x3c1   :  { %3752 = vpow2.f32 %v622_v42 }
 0x3c2   :  { %3754 = vpow2.f32 %v626_v44 }
 0x3c3   :  { %3756 = vpow2.f32 %v630_v45 }
 0x3c4   :  { %3758 = vpow2.f32 %v624_v47 }
 0x3c5   :  { %3760 = vpow2.f32 %v628_v48 }
 0x3c8   :  { %v3747_v49 = vpop.eup %3746 }
 0x3c9   :  { %v3749_v52 = vpop.eup %3748  ;;  %v632_v53 = vadd.f32 1.0, %v3747_v49 }
 0x3ca   :  { %v3751_v55 = vpop.eup %3750  ;;  %v634_v56 = vadd.f32 1.0, %v3749_v52 }
 0x3cb   :  { %v3753_v57 = vpop.eup %3752  ;;  %3762 = vrcp.f32 %v632_v53  ;;  %v633_v61 = vadd.f32 1.0, %v3751_v55  ;;  %v3507_v53 = vld [vmem:[%s5247_s6 + $0x10] ss:$8 sps:$4 sm:$0xff]  }
 0x3cc   :  { %v3755_v62 = vpop.eup %3754  ;;  %3764 = vrcp.f32 %v634_v56  ;;  %v635_v63 = vadd.f32 1.0, %v3753_v57 }
 0x3cd   :  { %v3757_v0 = vpop.eup %3756  ;;  %3766 = vrcp.f32 %v633_v61  ;;  %v637_v1 = vadd.f32 1.0, %v3755_v62  ;;  %v3512_v61 = vld [vmem:[%s5247_s6 + $0x24] ss:$8 sps:$4 sm:$0xff]  }
 0x3ce   :  { %v3759_v4 = vpop.eup %3758  ;;  %3768 = vrcp.f32 %v635_v63  ;;  %v639_v6 = vadd.f32 1.0, %v3757_v0 }
 0x3cf   :  { %v3761_v5 = vpop.eup %3760  ;;  %3770 = vrcp.f32 %v637_v1  ;;  %v636_v9 = vadd.f32 1.0, %v3759_v4 }
 0x3d0   :  { %3772 = vrcp.f32 %v639_v6  ;;  %v638_v25 = vadd.f32 1.0, %v3761_v5  ;;  %v3510_v6 = vld [vmem:[%s5247_s6 + $0x20] ss:$8 sps:$4 sm:$0xff]  }
 0x3d1   :  { %3774 = vrcp.f32 %v636_v9 }
 0x3d2   :  { %3776 = vrcp.f32 %v638_v25 }
 0x3d5   :  { %v3763_v10 = vpop.eup %3762 }
 0x3d6   :  { %v3765_v33 = vpop.eup %3764  ;;  %v4313_v11 = vmul.f32 %v3763_v10, %v600_v26  ;;  %v3504_v26 = vld [vmem:[%s5247_s6] ss:$8 sps:$4 sm:$0xff]  }
 0x3d7   :  { %v3767_v32 = vpop.eup %3766  ;;  %v4315_v18 = vmul.f32 %v3765_v33, %v602_v34  ;;  %v3708_v33 = vld [vmem:[%s5251_s7 + $0x240] ss:$8 sps:$4 sm:$0xff]  }
 0x3d8   :  { %v3769_v22 = vpop.eup %3768  ;;  %v649_v23 = vmul.f32 %v3767_v32, %v601_v27 }
 0x3d9   :  { %v3771_v24 = vpop.eup %3770  ;;  %v4317_v40 = vmul.f32 %v3769_v22, %v603_v38  ;;  %v656_v36 = vpack.c.bf16 %v4315_v18, %v4313_v11  ;;  %v693_v38 = vrot.slane %v4313_v11, 1  ;;  %v3515_v22 = vld [vmem:[%s5247_s6 + $0x34] ss:$8 sps:$4 sm:$0xff]  }
 0x3da   :  { %v3773_v31 = vpop.eup %3772  ;;  %v4322_v37 = vmul.f32 %v3771_v24, %v4301_v28  ;;  %v3509_v28 = vld [vmem:[%s5247_s6 + $0x14] ss:$8 sps:$4 sm:$0xff]   ;;  %v694_v49 = vrot.slane %v649_v23, 1  ;;  %v661_v56 = vrot.slane %v649_v23, 7 }
 0x3db   :  { %v3775_v39 = vpop.eup %3774  ;;  %v657_v42 = vpack.c.bf16 %v4317_v40, %v649_v23  ;;  %v4329_v34 = vmul.f32 %v3773_v31, %v4303_v15  ;;  %v696_v44 = vrot.slane %v4317_v40, 1  ;;  %v695_v15 = vrot.slane %v4315_v18, 1 }
 0x3dc   :  { %v3777_v27 = vpop.eup %3776  ;;  %v4337_v43 = vmul.f32 %v3775_v39, %v4305_v16  ;;  %v698_v45 = vrot.slane %v4322_v37, 1  ;;  %v663_v57 = vrot.slane %v4317_v40, 7 }
 0x3dd   :  { %982 = vmatprep.mubr.bf16.mxu1 %v657_v42  ;;  %v659_v47 = vpack.c.bf16 %v4329_v34, %v4322_v37  ;;  %v667_v48 = vrot.slane %v4329_v34, 7  ;;  %v4354_v55 = vmul.f32 %v3777_v27, %v4307_v17  ;;  %v4372_v63 = vsel %vm701_vm2, %v694_v49, %v696_v44  ;;  %v3518_v27 = vld [vmem:[%s5247_s6 + $0x44] ss:$8 sps:$4 sm:$0xff]  }
 0x3de   :  { %983 = vmatmul.mubr.bf16.vlgmr.msra.gmra.mrb[8].mxu1 %v656_v36  ;;  %v697_v52 = vrot.slane %v4337_v43, 1  ;;  %v4348_v16 = vsel %vm701_vm2, %v696_v44, %v698_v45  ;;  %v4376_v0 = vsel %vm701_vm2, %v693_v38, %v695_v15  ;;  %v674_v5 = vsel %vm668_vm3, %v661_v56, %v663_v57  ;;  %v3519_v44 = vld [vmem:[%s5247_s6 + $0x50] ss:$8 sps:$4 sm:$0xff]  }
 0x3df   :  { %1164 = vmatpush1.bf16.msra.mxu1 %v3504_v26  ;;  %992 = vmatprep.mubr.bf16.mxu1 %v659_v47  ;;  %v676_v17 = vsel %vm668_vm3, %v667_v48, %v661_v56  ;;  %v3019_v1 = vpack.c.bf16 %v4348_v16, %v4372_v63  ;;  %v700_v9 = vrot.slane %v4329_v34, 1  ;;  %v699_v25 = vrot.slane %v4354_v55, 1  ;;  %v3513_v26 = vld [vmem:[%s5247_s6 + $0x30] ss:$8 sps:$4 sm:$0xff]   ;;  %v3527_v47 = vld [vmem:[%s5247_s6 + $0x74] ss:$8 sps:$4 sm:$0xff]  }
 0x3e0   :  { %1165 = vmatprep.subr.bf16.mxu1 %v3509_v28  ;;  %v4363_v62 = vsel %vm701_vm2, %v695_v15, %v697_v52  ;;  %v658_v10 = vpack.c.bf16 %v4354_v55, %v4337_v43  ;;  %v2975_v32 = vpack.c.bf16 %v674_v5, %v676_v17  ;;  %v3521_v28 = vld [vmem:[%s5247_s6 + $0x54] ss:$8 sps:$4 sm:$0xff]   ;;  %v3522_v15 = vld [vmem:[%s5247_s6 + $0x60] ss:$8 sps:$4 sm:$0xff]   ;;  %v3536_v17 = vld [vmem:[%s5247_s6 + $0xa4] ss:$8 sps:$4 sm:$0xff]  }
 0x3e1   :  { %v3022_v4 = vpack.c.bf16 %v4363_v62, %v4376_v0  ;;  %v4403_v23 = vsel %vm701_vm2, %v698_v45, %v700_v9  ;;  %v4407_v24 = vsel %vm701_vm2, %v700_v9, %v694_v49  ;;  %v4411_v31 = vsel %vm701_vm2, %v697_v52, %v699_v25  ;;  %v3524_v45 = vld [vmem:[%s5247_s6 + $0x64] ss:$8 sps:$4 sm:$0xff]   ;;  %v3525_v49 = vld [vmem:[%s5247_s6 + $0x70] ss:$8 sps:$4 sm:$0xff]   ;;  %v3533_v56 = vld [vmem:[%s5247_s6 + $0x94] ss:$8 sps:$4 sm:$0xff]  }
 0x3e2   :  { %v4415_v36 = vsel %vm701_vm2, %v699_v25, %v693_v38  ;;  %v3025_v39 = vpack.c.bf16 %v4407_v24, %v4403_v23  ;;  %v3516_v38 = vld [vmem:[%s5247_s6 + $0x40] ss:$8 sps:$4 sm:$0xff]   ;;  %v3530_v52 = vld [vmem:[%s5247_s6 + $0x84] ss:$8 sps:$4 sm:$0xff]   ;;  %v3539_v5 = vld [vmem:[%s5247_s6 + $0xb4] ss:$8 sps:$4 sm:$0xff]  }
 0x3e3   :  { %1166 = vmatpush1.bf16.msra.mxu1 %v3507_v53  ;;  %v3028_v42 = vpack.c.bf16 %v4415_v36, %v4411_v31  ;;  %v3528_v53 = vld [vmem:[%s5247_s6 + $0x80] ss:$8 sps:$4 sm:$0xff]   ;;  %v3537_v9 = vld [vmem:[%s5247_s6 + $0xb0] ss:$8 sps:$4 sm:$0xff]   ;;  %v3542_v25 = vld [vmem:[%s5247_s6 + $0xc4] ss:$8 sps:$4 sm:$0xff]  }
 0x3e4   :  { %1167 = vmatprep.subr.bf16.mxu1 %v3512_v61  ;;  %v3531_v61 = vld [vmem:[%s5247_s6 + $0x90] ss:$8 sps:$4 sm:$0xff]   ;;  %v3557_v34 = vld [vmem:[%s5247_s6 + $0x214] ss:$8 sps:$4 sm:$0xff]   ;;  %v664_v40 = vrot.slane %v4337_v43, 7 }
 0x3e5   :  { %v3569_v16 = vld [vmem:[%s5247_s6 + $0x254] ss:$8 sps:$4 sm:$0xff]   ;;  %v3567_v63 = vld [vmem:[%s5247_s6 + $0x250] ss:$8 sps:$4 sm:$0xff]  }
 0x3e6   :  { %993 = vmatmul.mubr.bf16.gmra.mrb[12].mxu1 %v658_v10  ;;  %v3540_v10 = vld [vmem:[%s5247_s6 + $0xc0] ss:$8 sps:$4 sm:$0xff]  }
 0x3e7   :  { %1168 = vmatpush1.bf16.msra.mxu1 %v3510_v6  ;;  %2976 = vmatprep.mubr.msk.bf16.mxu1 %vm4394_vm6, %v2975_v32  ;;  %v3534_v6 = vld [vmem:[%s5247_s6 + $0xa0] ss:$8 sps:$4 sm:$0xff]   ;;  %v3545_v32 = vld [vmem:[%s5247_s6 + $0xd4] ss:$8 sps:$4 sm:$0xff]  }
 0x3e8   :  { %1169 = vmatprep.subr.bf16.mxu1 %v3515_v22  ;;  %v3543_v22 = vld [vmem:[%s5247_s6 + $0xd0] ss:$8 sps:$4 sm:$0xff]  }
 0x3eb   :  { %1170 = vmatpush1.bf16.msra.mxu1 %v3513_v26  ;;  %v3548_v26 = vld [vmem:[%s5247_s6 + $0xe4] ss:$8 sps:$4 sm:$0xff]  }
 0x3ec   :  { %1171 = vmatprep.subr.bf16.mxu1 %v3518_v27  ;;  %v3546_v27 = vld [vmem:[%s5247_s6 + $0xe0] ss:$8 sps:$4 sm:$0xff]  }
 0x3ef   :  { %1172 = vmatpush1.bf16.msra.mxu1 %v3516_v38  ;;  %v3551_v38 = vld [vmem:[%s5247_s6 + $0xf4] ss:$8 sps:$4 sm:$0xff]  }
 0x3f0   :  { %1173 = vmatprep.subr.bf16.mxu1 %v3521_v28  ;;  %v666_v28 = vrot.slane %v4354_v55, 7  ;;  %v3552_v55 = vld [vmem:[%s5247_s6 + $0x200] ss:$8 sps:$4 sm:$0xff]  }
 0x3f2   :  { %v669_v43 = vsel %vm668_vm3, %v664_v40, %v666_v28 }
 0x3f3   :  { %1174 = vmatpush1.bf16.msra.mxu1 %v3519_v44  ;;  %v665_v44 = vrot.slane %v4322_v37, 7 }
 0x3f4   :  { %1175 = vmatprep.subr.bf16.mxu1 %v3524_v45  ;;  %v660_v45 = vrot.slane %v4313_v11, 7 }
 0x3f5   :  { %v670_v11 = vsel %vm668_vm3, %v665_v44, %v667_v48 }
 0x3f7   :  { %1176 = vmatpush1.bf16.msra.mxu1 %v3522_v15  ;;  %v662_v15 = vrot.slane %v4315_v18, 7  ;;  %v672_v18 = vsel %vm668_vm3, %v663_v57, %v665_v44  ;;  %v3555_v57 = vld [vmem:[%s5247_s6 + $0x210] ss:$8 sps:$4 sm:$0xff]   ;;  %v3576_v44 = vld [vmem:[%s5247_s6 + $0x280] ss:$8 sps:$4 sm:$0xff]  }
 0x3f8   :  { %1177 = vmatprep.subr.bf16.mxu1 %v3527_v47  ;;  %v3549_v47 = vld [vmem:[%s5247_s6 + $0xf0] ss:$8 sps:$4 sm:$0xff]   ;;  %v2981_v48 = vpack.c.bf16 %v670_v11, %v672_v18  ;;  %v3590_v18 = vld [vmem:[%s5247_s6 + $0x2c4] ss:$8 sps:$4 sm:$0xff]  }
 0x3f9   :  { %v673_v37 = vsel %vm668_vm3, %v660_v45, %v662_v15  ;;  %v3585_v11 = vld [vmem:[%s5247_s6 + $0x2b0] ss:$8 sps:$4 sm:$0xff]  }
 0x3fb   :  { %1178 = vmatpush1.bf16.msra.mxu1 %v3525_v49  ;;  %v3554_v49 = vld [vmem:[%s5247_s6 + $0x204] ss:$8 sps:$4 sm:$0xff]  }
 0x3fc   :  { %1179 = vmatprep.subr.bf16.mxu1 %v3530_v52  ;;  %v675_v52 = vsel %vm668_vm3, %v666_v28, %v660_v45  ;;  %v3578_v28 = vld [vmem:[%s5247_s6 + $0x284] ss:$8 sps:$4 sm:$0xff]   ;;  %v3581_v45 = vld [vmem:[%s5247_s6 + $0x294] ss:$8 sps:$4 sm:$0xff]  }
 0x3ff   :  { %1180 = vmatpush1.bf16.msra.mxu1 %v3528_v53  ;;  %v2978_v53 = vpack.c.bf16 %v673_v37, %v675_v52  ;;  %v3587_v52 = vld [vmem:[%s5247_s6 + $0x2b4] ss:$8 sps:$4 sm:$0xff]   ;;  %v3588_v37 = vld [vmem:[%s5247_s6 + $0x2c0] ss:$8 sps:$4 sm:$0xff]  }
 0x400   :  { %1181 = vmatprep.subr.bf16.mxu1 %v3533_v56  ;;  %v40_v56 = vadd.s32 8, %v4114_v51  ;;  %v3705_v51 = vld [vmem:[%s5251_s7 + $0x230] ss:$8 sps:$4 sm:$0xff]  }
 0x402   :  { %vm44_vm7 = vcmp.ne.s32.totalorder %v40_v56, 15  ;;  %v3597_v56 = vld [vmem:[%s5247_s6 + $0x2f0] ss:$8 sps:$4 sm:$0xff]  }
 0x403   :  { %1182 = vmatpush1.bf16.msra.mxu1 %v3531_v61  ;;  %v3560_v61 = vld [vmem:[%s5247_s6 + $0x224] ss:$8 sps:$4 sm:$0xff]   ;;  %vm4543_vm8 = vmpackc.low %vm44_vm7, %vm3816_vm5 }
 0x404   :  { %1183 = vmatprep.subr.bf16.mxu1 %v3536_v17  ;;  %v671_v17 = vsel %vm668_vm3, %v662_v15, %v664_v40  ;;  %v3579_v15 = vld [vmem:[%s5247_s6 + $0x290] ss:$8 sps:$4 sm:$0xff]   ;;  %v3599_v40 = vld [vmem:[%s5247_s6 + $0x2f4] ss:$8 sps:$4 sm:$0xff]  }
 0x407   :  { %1184 = vmatpush1.bf16.msra.mxu1 %v3534_v6  ;;  %v3558_v6 = vld [vmem:[%s5247_s6 + $0x220] ss:$8 sps:$4 sm:$0xff]  }
 0x408   :  { %1185 = vmatprep.subr.bf16.mxu1 %v3539_v5  ;;  %v2984_v5 = vpack.c.bf16 %v669_v43, %v671_v17 }
 0x40b   :  { %1186 = vmatpush1.bf16.msra.mxu1 %v3537_v9 }
 0x40c   :  { %1187 = vmatprep.subr.bf16.mxu1 %v3542_v25  ;;  %v3563_v25 = vld [vmem:[%s5247_s6 + $0x234] ss:$8 sps:$4 sm:$0xff]  }
 0x40f   :  { %1188 = vmatpush1.bf16.msra.mxu1 %v3540_v10  ;;  %v3561_v10 = vld [vmem:[%s5247_s6 + $0x230] ss:$8 sps:$4 sm:$0xff]  }
 0x410   :  { %1189 = vmatprep.subr.bf16.mxu1 %v3545_v32  ;;  %v3566_v32 = vld [vmem:[%s5247_s6 + $0x244] ss:$8 sps:$4 sm:$0xff]  }
 0x413   :  { %1190 = vmatpush1.bf16.msra.mxu1 %v3543_v22  ;;  %v3564_v22 = vld [vmem:[%s5247_s6 + $0x240] ss:$8 sps:$4 sm:$0xff]  }
 0x414   :  { %1191 = vmatprep.subr.bf16.mxu1 %v3548_v26  ;;  %v3570_v26 = vld [vmem:[%s5247_s6 + $0x260] ss:$8 sps:$4 sm:$0xff]  }
 0x417   :  { %1192 = vmatpush1.bf16.msra.mxu1 %v3546_v27  ;;  %v3575_v27 = vld [vmem:[%s5247_s6 + $0x274] ss:$8 sps:$4 sm:$0xff]  }
 0x418   :  { %1193 = vmatprep.subr.bf16.mxu1 %v3551_v38  ;;  %v3573_v38 = vld [vmem:[%s5247_s6 + $0x270] ss:$8 sps:$4 sm:$0xff]  }
 0x41b   :  { %1194 = vmatpush1.bf16.msra.mxu1 %v3549_v47  ;;  %v3584_v47 = vld [vmem:[%s5247_s6 + $0x2a4] ss:$8 sps:$4 sm:$0xff]  }
 0x41c   :  { %1408 = vmatprep.subr.bf16.mxu1 %v3554_v49  ;;  %v3582_v49 = vld [vmem:[%s5247_s6 + $0x2a0] ss:$8 sps:$4 sm:$0xff]  }
 0x41e   :  { %2979 = vmatmul.mubr.msk.bf16.vlgmr.msra.gmra.mrb[8].mxu1 %vm4394_vm6, %v2978_v53  ;;  %v3591_v53 = vld [vmem:[%s5247_s6 + $0x2d0] ss:$8 sps:$4 sm:$0xff]  }
 0x41f   :  { %2982 = vmatprep.mubr.msk.bf16.mxu1 %vm4394_vm6, %v2981_v48  ;;  %1409 = vmatpush1.bf16.msra.mxu1 %v3552_v55  ;;  %v3593_v55 = vld [vmem:[%s5247_s6 + $0x2d4] ss:$8 sps:$4 sm:$0xff]   ;;  %v3594_v48 = vld [vmem:[%s5247_s6 + $0x2e0] ss:$8 sps:$4 sm:$0xff]  }
 0x420   :  { %1410 = vmatprep.subr.bf16.mxu1 %v3557_v34  ;;  %v3596_v34 = vld [vmem:[%s5247_s6 + $0x2e4] ss:$8 sps:$4 sm:$0xff]  }
 0x423   :  { %1411 = vmatpush1.bf16.msra.mxu1 %v3555_v57  ;;  %v3030_v57 = vld.sshfl [vmem:[%s5250_s1] sm:$0x33 pattern:$0x75316420] }
 0x424   :  { %1412 = vmatprep.subr.bf16.mxu1 %v3560_v61  ;;  %v1482_v62 = vrot.slane %v3030_v57, %v4121_v58  ;;  %v1478_v31 = vcombine.high %v3030_v57, %v3030_v57 }
 0x426   :  { %2985 = vmatmul.mubr.msk.bf16.gmra.mrb[12].mxu1 %vm4394_vm6, %v2984_v5 }
 0x427   :  { %1413 = vmatpush1.bf16.msra.mxu1 %v3558_v6  ;;  %3020 = vmatprep.mubr.msk.bf16.mxu1 %vm4543_vm8, %v3019_v1  ;;  %v3572_v1 = vld [vmem:[%s5247_s6 + $0x264] ss:$8 sps:$4 sm:$0xff]  }
 0x428   :  { %1414 = vmatprep.subr.bf16.mxu1 %v3563_v25  ;;  %v1490_v25 = vrot.slane %v1478_v31, %v4121_v58 }
 0x42b   :  { %1415 = vmatpush1.bf16.msra.mxu1 %v3561_v10 }
 0x42c   :  { %1416 = vmatprep.subr.bf16.mxu1 %v3566_v32 }
 0x42f   :  { %1417 = vmatpush1.bf16.msra.mxu1 %v3564_v22  ;;  %v1494_v22 = vrot.slane %v1478_v31, %v4124_v59 }
 0x430   :  { %1418 = vmatprep.subr.bf16.mxu1 %v3569_v16 }
 0x433   :  { %1419 = vmatpush1.bf16.msra.mxu1 %v3567_v63 }
 0x434   :  { %1420 = vmatprep.subr.bf16.mxu1 %v3572_v1 }
 0x437   :  { %1421 = vmatpush1.bf16.msra.mxu1 %v3570_v26 }
 0x438   :  { %1422 = vmatprep.subr.bf16.mxu1 %v3575_v27 }
 0x43b   :  { %1423 = vmatpush1.bf16.msra.mxu1 %v3573_v38 }
 0x43c   :  { %1424 = vmatprep.subr.bf16.mxu1 %v3578_v28 }
 0x43f   :  { %1425 = vmatpush1.bf16.msra.mxu1 %v3576_v44 }
 0x440   :  { %1426 = vmatprep.subr.bf16.mxu1 %v3581_v45 }
 0x443   :  { %1427 = vmatpush1.bf16.msra.mxu1 %v3579_v15 }
 0x444   :  { %1428 = vmatprep.subr.bf16.mxu1 %v3584_v47 }
 0x447   :  { %1429 = vmatpush1.bf16.msra.mxu1 %v3582_v49 }
 0x448   :  { %1430 = vmatprep.subr.bf16.mxu1 %v3587_v52 }
 0x44b   :  { %1431 = vmatpush1.bf16.msra.mxu1 %v3585_v11 }
 0x44c   :  { %1432 = vmatprep.subr.bf16.mxu1 %v3590_v18 }
 0x44f   :  { %1433 = vmatpush1.bf16.msra.mxu1 %v3588_v37 }
 0x450   :  { %1434 = vmatprep.subr.bf16.mxu1 %v3593_v55 }
 0x453   :  { %1435 = vmatpush1.bf16.msra.mxu1 %v3591_v53 }
 0x454   :  { %1436 = vmatprep.subr.bf16.mxu1 %v3596_v34 }
 0x457   :  { %1437 = vmatpush1.bf16.msra.mxu1 %v3594_v48 }
 0x458   :  { %1438 = vmatprep.subr.bf16.mxu1 %v3599_v40 }
 0x45b   :  { %1439 = vmatpush1.bf16.msra.mxu1 %v3597_v56 }
 0x45e   :  { %3023 = vmatmul.mubr.msk.bf16.vlgmr.msra.gmra.mrb[8].mxu1 %vm4543_vm8, %v3022_v4  ;;  %v1486_v4 = vrot.slane %v3030_v57, %v4124_v59 }
 0x45f   :  { %3026 = vmatprep.mubr.msk.bf16.mxu1 %vm4543_vm8, %v3025_v39 }
 0x466   :  { %3029 = vmatmul.mubr.msk.bf16.gmra.mrb[12].mxu1 %vm4543_vm8, %v3028_v42 }
 0x531   :  { %v1442_v0 = vpop.f32.mrb[8].mxu1 }
 0x532   :  { %v1444_v61 = vpop.f32.mrb[9].mxu1  ;;  %v4652_v24 = vadd.f32 %v1482_v62, %v1442_v0 }
 0x533   :  { %v1446_v23 = vpop.f32.mrb[10].mxu1  ;;  %v4656_v36 = vadd.f32 %v1486_v4, %v1444_v61 }
 0x534   :  { %v4654_v39 = vadd.f32 %v1482_v62, %v1446_v23  ;;  %v1448_v43 = vpop.f32.mrb[11].mxu1 }
 0x535   :  { %v4658_v42 = vadd.f32 %v1486_v4, %v1448_v43 }
 0x536   :  { %v1507_v17 = vadd.f32 %v4654_v39, %v4652_v24 }
 0x537   :  { %v1514_v6 = vadd.f32 %v4658_v42, %v4656_v36 }
 0x538   :  { %v1508_v5 = vrot.slane %v1507_v17, 4 }
 0x539   :  { %v1515_v10 = vrot.slane %v1514_v6, 4  ;;  %v1452_v32 = vpop.f32.mrb[12].mxu1 }
 0x53a   :  { %v1454_v16 = vpop.f32.mrb[13].mxu1  ;;  %v1509_v26 = vadd.f32 %v1508_v5, %v1507_v17  ;;  %v4666_v27 = vadd.f32 %v1490_v25, %v1452_v32 }
 0x53b   :  { %v1516_v63 = vadd.f32 %v1515_v10, %v1514_v6  ;;  %v1456_v1 = vpop.f32.mrb[14].mxu1  ;;  %v4670_v44 = vadd.f32 %v1494_v22, %v1454_v16 }
 0x53c   :  { %v4668_v38 = vadd.f32 %v1490_v25, %v1456_v1  ;;  %v1458_v28 = vpop.f32.mrb[15].mxu1  ;;  %v1510_v52 = vrot.slane %v1509_v26, 2  ;;  %v4683_v25 = vld [vmem:[%s5246_s10] sm:$0xff] }
 0x53d   :  { %v4672_v45 = vadd.f32 %v1494_v22, %v1458_v28  ;;  %v1517_v47 = vrot.slane %v1516_v63, 2 }
 0x53e   :  { %v1521_v15 = vadd.f32 %v4668_v38, %v4666_v27  ;;  %v1511_v34 = vadd.f32 %v1510_v52, %v1509_v26 }
 0x53f   :  { %v1528_v49 = vadd.f32 %v4672_v45, %v4670_v44  ;;  %v1518_v53 = vadd.f32 %v1517_v47, %v1516_v63 }
 0x540   :  { %v1522_v11 = vrot.slane %v1521_v15, 4  ;;  %v1512_v0 = vrot.slane %v1511_v34, 1 }
 0x541   :  { %v1529_v18 = vrot.slane %v1528_v49, 4  ;;  %v1519_v57 = vrot.slane %v1518_v53, 1 }
 0x542   :  { %v1523_v37 = vadd.f32 %v1522_v11, %v1521_v15  ;;  %v1513_v17 = vadd.f32 %v1512_v0, %v1511_v34 }
 0x543   :  { %v1530_v55 = vadd.f32 %v1529_v18, %v1528_v49  ;;  %v1520_v43 = vadd.f32 %v1519_v57, %v1518_v53 }
 0x544   :  { %v1524_v48 = vrot.slane %v1523_v37, 2 }
 0x545   :  { %v1531_v40 = vrot.slane %v1530_v55, 2 }
 0x546   :  { %v1525_v56 = vadd.f32 %v1524_v48, %v1523_v37 }
 0x547   :  { %v1532_v62 = vadd.f32 %v1531_v40, %v1530_v55 }
 0x548   :  { %v1526_v4 = vrot.slane %v1525_v56, 1 }
 0x549   :  { %v1533_v61 = vrot.slane %v1532_v62, 1 }
 0x54a   :  { %v1527_v23 = vadd.f32 %v1526_v4, %v1525_v56 }
 0x54b   :  { %v1534_v31 = vadd.f32 %v1533_v61, %v1532_v62 }
 0x54c   :  { %v1539_v5 = vsel %vm117_vm0, %v1527_v23, %v1513_v17 }
 0x54d   :  { %v1540_v6 = vsel %vm117_vm0, %v1534_v31, %v1520_v43 }
 0x54e   :  { %1607 = vmatprep.mubr.f32.mxu0 %v1540_v6 }
 0x54f   :  { %1608 = vmatmul.mubr.f32.vlgmr.msra.gmra.mrb[0].mxu0 %v1539_v5 }
 0x550   :  { %1618 = vmatpush1.msra.mxu0 %v4683_v25  ;;  %1681 = vmatprep.mubr.f32.mxu0 %v3814_v41 }
 0x551   :  { %3390 = vmatprep.subr.bf16.mxu0 %v3886_v3  ;;  %v3813_v3 = vld [vmem:[%s5246_s10 + $0x8] sm:$0xff] }
 0x622   :  { %v3255_v10 = vpop.f32.mrb[0].mxu0 }
 0x623   :  { %v3256_v32 = vpop.f32.mrb[1].mxu0 }
 0x624   :  { %v3257_v22 = vadd.f32 %v3256_v32, %v3255_v10 }
 0x626   :  { %v1613_v16 = vmul.f32 0.001953125, %v3257_v22 }
 0x628   :  { %3031 = vmatmul.mubr.msk.f32.vlgmr.msra.gmra.mrb[2].mxu0 %vm196_vm1, %v1613_v16 }
 0x629   :  { %3392 = vmatpush3.bf16.msra.mxu0 %v3897_v7 }
 0x62a   :  { %3394 = vmatprep.subr.bf16.mxu0 %v3899_v8 }
 0x62d   :  { %3396 = vmatpush3.bf16.msra.mxu0 %v3916_v13 }
 0x62e   :  { %3398 = vmatprep.subr.bf16.mxu0 %v3920_v14 }
 0x631   :  { %3400 = vmatpush3.bf16.msra.mxu0 %v3936_v19 }
 0x632   :  { %3402 = vmatprep.subr.bf16.mxu0 %v3940_v20 }
 0x635   :  { %3404 = vmatpush3.bf16.msra.mxu0 %v3976_v29 }
 0x636   :  { %3406 = vmatprep.subr.bf16.mxu0 %v3999_v35 }
 0x639   :  { %3408 = vmatpush3.bf16.msra.mxu0 %v4024_v46 }
 0x63a   :  { %3410 = vmatprep.subr.bf16.mxu0 %v4028_v50 }
 0x63d   :  { %3412 = vmatpush3.bf16.msra.mxu0 %v4044_v60 }
 0x63e   :  { %3414 = vmatprep.subr.bf16.mxu0 %v4054_v2 }
 0x641   :  { %3416 = vmatpush3.bf16.msra.mxu0 %v4063_v12 }
 0x642   :  { %3418 = vmatprep.subr.bf16.mxu0 %v4068_v21 }
 0x645   :  { %3420 = vmatpush3.bf16.msra.mxu0 %v4079_v30 }
 0x646   :  { %1861 = vmatprep.subr.mxu0 %v3813_v3 }
 0x6fb   :  { %v1683_v7 = vpop.f32.mrb[2].mxu0 }
 0x6fc   :  { %v1685_v8 = vpop.f32.mrb[3].mxu0 }
 0x6fd   :  { %v1690_v13 = vcombine.low %v1683_v7, %v1685_v8  ;;  %v3602_v8 = vld [vmem:[%s5251_s7 + $0x104] ss:$8 sps:$4 sm:$0xff]  }
 0x6ff   :  { %v1697_v14 = vrot.slane %v1690_v13, %v4117_v54 }
 0x701   :  { %v1698_v19 = vcombine.high %v1697_v14, %v1697_v14  ;;  %v1705_v20 = vrot.slane %v1697_v14, %v4117_v54 }
 0x703   :  { %v1712_v29 = vrot.slane %v1698_v19, %v4117_v54  ;;  %v1716_v35 = vrot.slane %v1705_v20, %v4121_v58  ;;  %v1720_v46 = vrot.slane %v1705_v20, %v4124_v59 }
 0x705   :  { %v1724_v50 = vrot.slane %v1712_v29, %v4121_v58  ;;  %v1728_v60 = vrot.slane %v1712_v29, %v4124_v59  ;;  %v4715_v2 = vsub.f32 %v4652_v24, %v1716_v35  ;;  %v4718_v12 = vsub.f32 %v4656_v36, %v1720_v46 }
 0x706   :  { %v4721_v21 = vsub.f32 %v4654_v39, %v1716_v35  ;;  %v4724_v30 = vsub.f32 %v4658_v42, %v1720_v46  ;;  %v3600_v35 = vld [vmem:[%s5251_s7 + $0x100] ss:$8 sps:$4 sm:$0xff]   ;;  %v3603_v46 = vld [vmem:[%s5251_s7 + $0x110] ss:$8 sps:$4 sm:$0xff]  }
 0x707   :  { %v4727_v63 = vsub.f32 %v4666_v27, %v1724_v50  ;;  %v4730_v1 = vsub.f32 %v4670_v44, %v1728_v60  ;;  %v4733_v26 = vsub.f32 %v4668_v38, %v1724_v50  ;;  %v4736_v24 = vsub.f32 %v4672_v45, %v1728_v60  ;;  %v3608_v50 = vld [vmem:[%s5251_s7 + $0x124] ss:$8 sps:$4 sm:$0xff]   ;;  %v3606_v60 = vld [vmem:[%s5251_s7 + $0x120] ss:$8 sps:$4 sm:$0xff]  }
 0x708   :  { %v1741_v36 = vmul.f32 %v4715_v2, %v4715_v2  ;;  %v1742_v39 = vmul.f32 %v4718_v12, %v4718_v12  ;;  %v1743_v42 = vmul.f32 %v4721_v21, %v4721_v21  ;;  %v1744_v27 = vmul.f32 %v4724_v30, %v4724_v30 }
 0x709   :  { %v1745_v28 = vmul.f32 %v4727_v63, %v4727_v63  ;;  %v1746_v38 = vmul.f32 %v4730_v1, %v4730_v1  ;;  %v1747_v44 = vmul.f32 %v4733_v26, %v4733_v26  ;;  %v1748_v45 = vmul.f32 %v4736_v24, %v4736_v24 }
 0x70a   :  { %v1749_v15 = vadd.f32 %v1743_v42, %v1741_v36  ;;  %v1756_v47 = vadd.f32 %v1744_v27, %v1742_v39  ;;  %v3611_v36 = vld [vmem:[%s5251_s7 + $0x134] ss:$8 sps:$4 sm:$0xff]   ;;  %v3609_v39 = vld [vmem:[%s5251_s7 + $0x130] ss:$8 sps:$4 sm:$0xff]   ;;  %v3612_v42 = vld [vmem:[%s5251_s7 + $0x140] ss:$8 sps:$4 sm:$0xff]  }
 0x70b   :  { %v1770_v49 = vadd.f32 %v1748_v45, %v1746_v38  ;;  %v1763_v52 = vadd.f32 %v1747_v44, %v1745_v28  ;;  %v3614_v27 = vld [vmem:[%s5251_s7 + $0x144] ss:$8 sps:$4 sm:$0xff]   ;;  %v3617_v28 = vld [vmem:[%s5251_s7 + $0x154] ss:$8 sps:$4 sm:$0xff]   ;;  %v3615_v38 = vld [vmem:[%s5251_s7 + $0x150] ss:$8 sps:$4 sm:$0xff]  }
 0x70c   :  { %v1757_v11 = vrot.slane %v1756_v47, 4  ;;  %v1750_v18 = vrot.slane %v1749_v15, 4  ;;  %v3620_v44 = vld [vmem:[%s5251_s7 + $0x164] ss:$8 sps:$4 sm:$0xff]   ;;  %v3618_v45 = vld [vmem:[%s5251_s7 + $0x160] ss:$8 sps:$4 sm:$0xff]  }
 0x70d   :  { %v1771_v37 = vrot.slane %v1770_v49, 4  ;;  %v1764_v55 = vrot.slane %v1763_v52, 4 }
 0x70e   :  { %v1758_v53 = vadd.f32 %v1757_v11, %v1756_v47  ;;  %v1751_v34 = vadd.f32 %v1750_v18, %v1749_v15  ;;  %v3623_v15 = vld [vmem:[%s5251_s7 + $0x174] ss:$8 sps:$4 sm:$0xff]   ;;  %v3621_v47 = vld [vmem:[%s5251_s7 + $0x170] ss:$8 sps:$4 sm:$0xff]  }
 0x70f   :  { %v1772_v48 = vadd.f32 %v1771_v37, %v1770_v49  ;;  %v1765_v40 = vadd.f32 %v1764_v55, %v1763_v52  ;;  %v3626_v49 = vld [vmem:[%s5251_s7 + $0x184] ss:$8 sps:$4 sm:$0xff]   ;;  %v3624_v52 = vld [vmem:[%s5251_s7 + $0x180] ss:$8 sps:$4 sm:$0xff]   ;;  %v3629_v11 = vld [vmem:[%s5251_s7 + $0x194] ss:$8 sps:$4 sm:$0xff]  }
 0x710   :  { %v1759_v56 = vrot.slane %v1758_v53, 2  ;;  %v1752_v57 = vrot.slane %v1751_v34, 2  ;;  %v3627_v18 = vld [vmem:[%s5251_s7 + $0x190] ss:$8 sps:$4 sm:$0xff]   ;;  %v3632_v37 = vld [vmem:[%s5251_s7 + $0x1a4] ss:$8 sps:$4 sm:$0xff]  }
 0x711   :  { %v1773_v62 = vrot.slane %v1772_v48, 2  ;;  %v1766_v0 = vrot.slane %v1765_v40, 2  ;;  %v3630_v55 = vld [vmem:[%s5251_s7 + $0x1a0] ss:$8 sps:$4 sm:$0xff]  }
 0x712   :  { %v1760_v4 = vadd.f32 %v1759_v56, %v1758_v53  ;;  %v1753_v61 = vadd.f32 %v1752_v57, %v1751_v34  ;;  %v3635_v53 = vld [vmem:[%s5251_s7 + $0x1b4] ss:$8 sps:$4 sm:$0xff]   ;;  %v3633_v34 = vld [vmem:[%s5251_s7 + $0x1b0] ss:$8 sps:$4 sm:$0xff]  }
 0x713   :  { %v1774_v23 = vadd.f32 %v1773_v62, %v1772_v48  ;;  %v1767_v43 = vadd.f32 %v1766_v0, %v1765_v40  ;;  %v3636_v48 = vld [vmem:[%s5251_s7 + $0x1c0] ss:$8 sps:$4 sm:$0xff]   ;;  %v3638_v40 = vld [vmem:[%s5251_s7 + $0x1c4] ss:$8 sps:$4 sm:$0xff]   ;;  %v3641_v56 = vld [vmem:[%s5251_s7 + $0x1d4] ss:$8 sps:$4 sm:$0xff]  }
 0x714   :  { %v1761_v31 = vrot.slane %v1760_v4, 1  ;;  %v1754_v17 = vrot.slane %v1753_v61, 1  ;;  %v3639_v57 = vld [vmem:[%s5251_s7 + $0x1d0] ss:$8 sps:$4 sm:$0xff]   ;;  %v3644_v62 = vld [vmem:[%s5251_s7 + $0x1e4] ss:$8 sps:$4 sm:$0xff]  }
 0x715   :  { %v1775_v6 = vrot.slane %v1774_v23, 1  ;;  %v1768_v5 = vrot.slane %v1767_v43, 1  ;;  %v3642_v0 = vld [vmem:[%s5251_s7 + $0x1e0] ss:$8 sps:$4 sm:$0xff]  }
 0x716   :  { %v1762_v10 = vadd.f32 %v1761_v31, %v1760_v4  ;;  %v1755_v22 = vadd.f32 %v1754_v17, %v1753_v61  ;;  %v3647_v4 = vld [vmem:[%s5251_s7 + $0x1f4] ss:$8 sps:$4 sm:$0xff]   ;;  %v3645_v61 = vld [vmem:[%s5251_s7 + $0x1f0] ss:$8 sps:$4 sm:$0xff]  }
 0x717   :  { %v1776_v32 = vadd.f32 %v1775_v6, %v1774_v23  ;;  %v1769_v16 = vadd.f32 %v1768_v5, %v1767_v43  ;;  %v3650_v23 = vld [vmem:[%s5251_s7 + $0x4] ss:$8 sps:$4 sm:$0xff]  }
 0x719   :  { %v1782_v3 = vsel %vm117_vm0, %v1776_v32, %v1762_v10  ;;  %v1781_v7 = vsel %vm117_vm0, %v1769_v16, %v1755_v22  ;;  %v1985_v32 = vld [vmem:[%s5252_s4] sm:$0x3] }
 0x71a   :  { %1849 = vmatprep.mubr.f32.mxu0 %v1782_v3 }
 0x71b   :  { %1850 = vmatmul.mubr.f32.vlgmr.msra.gmra.mrb[4].mxu0 %v1781_v7  ;;  %v2005_v7 = vld [vmem:[%s5253_s5] sm:$0x3] }
 0x71c   :  { %1862 = vmatpush1.msra.mxu0 %v4683_v25  ;;  %1925 = vmatprep.mubr.f32.mxu0 %v3814_v41  ;;  %v3605_v25 = vld [vmem:[%s5251_s7 + $0x114] ss:$8 sps:$4 sm:$0xff]  }
 0x71d   :  { %2357 = vmatprep.subr.bf16.mxu0 %v3602_v8  ;;  %v1990_v8 = vrot.slane %v1985_v32, %v4121_v58 }
 0x7ee   :  { %v3290_v13 = vpop.f32.mrb[4].mxu0 }
 0x7ef   :  { %v3291_v14 = vpop.f32.mrb[5].mxu0 }
 0x7f0   :  { %v3292_v19 = vadd.f32 %v3291_v14, %v3290_v13  ;;  %v1994_v13 = vrot.slane %v1985_v32, %v4124_v59 }
 0x7f2   :  { %v1855_v20 = vmul.f32 0.001953125, %v3292_v19 }
 0x7f4   :  { %v1856_v29 = vadd.f32 1e-05, %v1855_v20 }
 0x7f6   :  { %3778 = vrsqrt.f32 %v1856_v29 }
 0x800   :  { %v3779_v41 = vpop.eup %3778 }
 0x801   :  { %3032 = vmatmul.mubr.msk.f32.vlgmr.msra.gmra.mrb[6].mxu0 %vm196_vm1, %v3779_v41  ;;  %v2014_v41 = vrot.slane %v2005_v7, %v4124_v59 }
 0x802   :  { %2358 = vmatpush1.bf16.msra.mxu0 %v3600_v35 }
 0x803   :  { %2359 = vmatprep.subr.bf16.mxu0 %v3605_v25  ;;  %v2010_v25 = vrot.slane %v2005_v7, %v4121_v58 }
 0x806   :  { %2360 = vmatpush1.bf16.msra.mxu0 %v3603_v46 }
 0x807   :  { %2361 = vmatprep.subr.bf16.mxu0 %v3608_v50 }
 0x80a   :  { %2362 = vmatpush1.bf16.msra.mxu0 %v3606_v60 }
 0x80b   :  { %2363 = vmatprep.subr.bf16.mxu0 %v3611_v36 }
 0x80e   :  { %2364 = vmatpush1.bf16.msra.mxu0 %v3609_v39 }
 0x80f   :  { %2365 = vmatprep.subr.bf16.mxu0 %v3614_v27 }
 0x812   :  { %2366 = vmatpush1.bf16.msra.mxu0 %v3612_v42 }
 0x813   :  { %2367 = vmatprep.subr.bf16.mxu0 %v3617_v28 }
 0x816   :  { %2368 = vmatpush1.bf16.msra.mxu0 %v3615_v38 }
 0x817   :  { %2369 = vmatprep.subr.bf16.mxu0 %v3620_v44 }
 0x81a   :  { %2370 = vmatpush1.bf16.msra.mxu0 %v3618_v45 }
 0x81b   :  { %2371 = vmatprep.subr.bf16.mxu0 %v3623_v15 }
 0x81e   :  { %2372 = vmatpush1.bf16.msra.mxu0 %v3621_v47 }
 0x81f   :  { %2373 = vmatprep.subr.bf16.mxu0 %v3626_v49 }
 0x822   :  { %2374 = vmatpush1.bf16.msra.mxu0 %v3624_v52 }
 0x823   :  { %2375 = vmatprep.subr.bf16.mxu0 %v3629_v11 }
 0x826   :  { %2376 = vmatpush1.bf16.msra.mxu0 %v3627_v18 }
 0x827   :  { %2377 = vmatprep.subr.bf16.mxu0 %v3632_v37 }
 0x82a   :  { %2378 = vmatpush1.bf16.msra.mxu0 %v3630_v55 }
 0x82b   :  { %2379 = vmatprep.subr.bf16.mxu0 %v3635_v53 }
 0x82e   :  { %2380 = vmatpush1.bf16.msra.mxu0 %v3633_v34 }
 0x82f   :  { %2381 = vmatprep.subr.bf16.mxu0 %v3638_v40 }
 0x832   :  { %2382 = vmatpush1.bf16.msra.mxu0 %v3636_v48 }
 0x833   :  { %2383 = vmatprep.subr.bf16.mxu0 %v3641_v56 }
 0x836   :  { %2384 = vmatpush1.bf16.msra.mxu0 %v3639_v57 }
 0x837   :  { %2385 = vmatprep.subr.bf16.mxu0 %v3644_v62 }
 0x83a   :  { %2386 = vmatpush1.bf16.msra.mxu0 %v3642_v0 }
 0x83b   :  { %2387 = vmatprep.subr.bf16.mxu0 %v3647_v4 }
 0x83e   :  { %2388 = vmatpush1.bf16.msra.mxu0 %v3645_v61 }
 0x83f   :  { %2570 = vmatprep.subr.bf16.mxu0 %v3650_v23 }
 0x8d4   :  { %v1927_v43 = vpop.f32.mrb[6].mxu0 }
 0x8d5   :  { %v1929_v31 = vpop.f32.mrb[7].mxu0 }
 0x8d6   :  { %v1934_v17 = vcombine.low %v1927_v43, %v1929_v31 }
 0x8d8   :  { %v1941_v6 = vrot.slane %v1934_v17, %v4117_v54 }
 0x8da   :  { %v1942_v5 = vcombine.high %v1941_v6, %v1941_v6  ;;  %v1949_v10 = vrot.slane %v1941_v6, %v4117_v54 }
 0x8dc   :  { %v1956_v22 = vrot.slane %v1942_v5, %v4117_v54  ;;  %v1960_v16 = vrot.slane %v1949_v10, %v4121_v58  ;;  %v1964_v3 = vrot.slane %v1949_v10, %v4124_v59 }
 0x8de   :  { %v1968_v14 = vrot.slane %v1956_v22, %v4121_v58  ;;  %v1972_v19 = vrot.slane %v1956_v22, %v4124_v59  ;;  %v1977_v20 = vmul.f32 %v1960_v16, %v4715_v2  ;;  %v1978_v54 = vmul.f32 %v1964_v3, %v4718_v12 }
 0x8df   :  { %v1979_v29 = vmul.f32 %v1960_v16, %v4721_v21  ;;  %v1980_v35 = vmul.f32 %v1964_v3, %v4724_v30 }
 0x8e0   :  { %v1981_v46 = vmul.f32 %v1968_v14, %v4727_v63  ;;  %v1982_v50 = vmul.f32 %v1972_v19, %v4730_v1  ;;  %v1983_v60 = vmul.f32 %v1968_v14, %v4733_v26  ;;  %v1984_v36 = vmul.f32 %v1972_v19, %v4736_v24 }
 0x8e1   :  { %v1997_v39 = vmul.f32 %v1990_v8, %v1977_v20  ;;  %v1998_v2 = vmul.f32 %v1994_v13, %v1978_v54  ;;  %v1999_v42 = vmul.f32 %v1990_v8, %v1979_v29  ;;  %v2000_v12 = vmul.f32 %v1994_v13, %v1980_v35 }
 0x8e2   :  { %v2002_v27 = vmul.f32 %v1994_v13, %v1982_v50  ;;  %v2004_v21 = vmul.f32 %v1994_v13, %v1984_v36  ;;  %v2001_v28 = vmul.f32 %v1990_v8, %v1981_v46  ;;  %v2003_v30 = vmul.f32 %v1990_v8, %v1983_v60 }
 0x8e3   :  { %v2017_v38 = vadd.f32 %v2010_v25, %v1997_v39  ;;  %v2019_v44 = vadd.f32 %v2010_v25, %v1999_v42  ;;  %v2018_v45 = vadd.f32 %v2014_v41, %v1998_v2  ;;  %v2020_v15 = vadd.f32 %v2014_v41, %v2000_v12  ;;  %v3648_v12 = vld [vmem:[%s5251_s7] ss:$8 sps:$4 sm:$0xff]  }
 0x8e4   :  { %v4883_v47 = vadd.f32 %v2014_v41, %v2002_v27  ;;  %v4885_v63 = vadd.f32 %v2014_v41, %v2004_v21  ;;  %v4887_v1 = vadd.f32 %v2010_v25, %v2001_v28  ;;  %v4889_v26 = vadd.f32 %v2010_v25, %v2003_v30  ;;  %v3653_v30 = vld [vmem:[%s5251_s7 + $0x14] ss:$8 sps:$4 sm:$0xff]  }
 0x8e5   :  { %v2025_v24 = vsub.f32 0.0, %v2017_v38  ;;  %v2027_v49 = vsub.f32 0.0, %v2019_v44  ;;  %v2026_v52 = vsub.f32 0.0, %v2018_v45  ;;  %v2028_v11 = vsub.f32 0.0, %v2020_v15 }
 0x8e6   :  { %v2030_v18 = vsub.f32 0.0, %v4883_v47  ;;  %v2032_v37 = vsub.f32 0.0, %v4885_v63  ;;  %v2029_v55 = vsub.f32 0.0, %v4887_v1  ;;  %v2031_v56 = vsub.f32 0.0, %v4889_v26 }
 0x8e7   :  { %v2033_v53 = vmul.f32 1.442695, %v2025_v24  ;;  %v2037_v34 = vmul.f32 1.442695, %v2027_v49  ;;  %v2035_v48 = vmul.f32 1.442695, %v2026_v52 }
 0x8e8   :  { %v2039_v40 = vmul.f32 1.442695, %v2028_v11  ;;  %v2043_v57 = vmul.f32 1.442695, %v2030_v18  ;;  %v2047_v62 = vmul.f32 1.442695, %v2032_v37 }
 0x8e9   :  { %3780 = vpow2.f32 %v2033_v53  ;;  %v2041_v0 = vmul.f32 1.442695, %v2029_v55  ;;  %v2045_v4 = vmul.f32 1.442695, %v2031_v56  ;;  %v3651_v52 = vld [vmem:[%s5251_s7 + $0x10] ss:$8 sps:$4 sm:$0xff]  }
 0x8ea   :  { %3782 = vpow2.f32 %v2037_v34  ;;  %v3656_v55 = vld [vmem:[%s5251_s7 + $0x24] ss:$8 sps:$4 sm:$0xff]  }
 0x8eb   :  { %3784 = vpow2.f32 %v2035_v48 }
 0x8ec   :  { %3786 = vpow2.f32 %v2039_v40 }
 0x8ed   :  { %3788 = vpow2.f32 %v2043_v57  ;;  %v3654_v57 = vld [vmem:[%s5251_s7 + $0x20] ss:$8 sps:$4 sm:$0xff]  }
 0x8ee   :  { %3790 = vpow2.f32 %v2047_v62 }
 0x8ef   :  { %3792 = vpow2.f32 %v2041_v0 }
 0x8f0   :  { %3794 = vpow2.f32 %v2045_v4 }
 0x8f3   :  { %v3781_v61 = vpop.eup %3780 }
 0x8f4   :  { %v3783_v23 = vpop.eup %3782  ;;  %v2049_v43 = vadd.f32 1.0, %v3781_v61 }
 0x8f5   :  { %v3785_v31 = vpop.eup %3784  ;;  %v2051_v17 = vadd.f32 1.0, %v3783_v23 }
 0x8f6   :  { %v3787_v6 = vpop.eup %3786  ;;  %3796 = vrcp.f32 %v2049_v43  ;;  %v2050_v5 = vadd.f32 1.0, %v3785_v31  ;;  %v3659_v43 = vld [vmem:[%s5251_s7 + $0x34] ss:$8 sps:$4 sm:$0xff]  }
 0x8f7   :  { %v3789_v10 = vpop.eup %3788  ;;  %3798 = vrcp.f32 %v2051_v17  ;;  %v2052_v32 = vadd.f32 1.0, %v3787_v6 }
 0x8f8   :  { %v3791_v22 = vpop.eup %3790  ;;  %3800 = vrcp.f32 %v2050_v5  ;;  %v2054_v16 = vadd.f32 1.0, %v3789_v10 }
 0x8f9   :  { %v3793_v3 = vpop.eup %3792  ;;  %3802 = vrcp.f32 %v2052_v32  ;;  %v2056_v7 = vadd.f32 1.0, %v3791_v22  ;;  %v3657_v22 = vld [vmem:[%s5251_s7 + $0x30] ss:$8 sps:$4 sm:$0xff]  }
 0x8fa   :  { %v3795_v8 = vpop.eup %3794  ;;  %3804 = vrcp.f32 %v2054_v16  ;;  %v2053_v13 = vadd.f32 1.0, %v3793_v3  ;;  %v3662_v16 = vld [vmem:[%s5251_s7 + $0x44] ss:$8 sps:$4 sm:$0xff]   ;;  %v3660_v3 = vld [vmem:[%s5251_s7 + $0x40] ss:$8 sps:$4 sm:$0xff]  }
 0x8fb   :  { %3806 = vrcp.f32 %v2056_v7  ;;  %v2055_v14 = vadd.f32 1.0, %v3795_v8  ;;  %v3665_v7 = vld [vmem:[%s5251_s7 + $0x54] ss:$8 sps:$4 sm:$0xff]   ;;  %v3663_v8 = vld [vmem:[%s5251_s7 + $0x50] ss:$8 sps:$4 sm:$0xff]  }
 0x8fc   :  { %3808 = vrcp.f32 %v2053_v13  ;;  %v3668_v13 = vld [vmem:[%s5251_s7 + $0x64] ss:$8 sps:$4 sm:$0xff]  }
 0x8fd   :  { %3810 = vrcp.f32 %v2055_v14  ;;  %v3666_v14 = vld [vmem:[%s5251_s7 + $0x60] ss:$8 sps:$4 sm:$0xff]  }
 0x900   :  { %v3797_v19 = vpop.eup %3796 }
 0x901   :  { %v3799_v20 = vpop.eup %3798  ;;  %v4895_v54 = vmul.f32 %v3797_v19, %v2017_v38  ;;  %v3671_v19 = vld [vmem:[%s5251_s7 + $0x74] ss:$8 sps:$4 sm:$0xff]  }
 0x902   :  { %v3801_v29 = vpop.eup %3800  ;;  %v4897_v35 = vmul.f32 %v3799_v20, %v2019_v44  ;;  %v3669_v20 = vld [vmem:[%s5251_s7 + $0x70] ss:$8 sps:$4 sm:$0xff]  }
 0x903   :  { %v3803_v25 = vpop.eup %3802  ;;  %v2066_v41 = vmul.f32 %v3801_v29, %v2018_v45  ;;  %v2105_v28 = vrot.slane %v4895_v54, 1  ;;  %v3674_v29 = vld [vmem:[%s5251_s7 + $0x84] ss:$8 sps:$4 sm:$0xff]  }
 0x904   :  { %v3805_v46 = vpop.eup %3804  ;;  %v4899_v50 = vmul.f32 %v3803_v25, %v2020_v15  ;;  %v2073_v36 = vpack.c.bf16 %v4897_v35, %v4895_v54  ;;  %v2107_v15 = vrot.slane %v4897_v35, 1  ;;  %v3672_v25 = vld [vmem:[%s5251_s7 + $0x80] ss:$8 sps:$4 sm:$0xff]  }
 0x905   :  { %v3807_v60 = vpop.eup %3806  ;;  %v4904_v39 = vmul.f32 %v3805_v46, %v4883_v47  ;;  %v2106_v24 = vrot.slane %v2066_v41, 1  ;;  %v2078_v18 = vrot.slane %v2066_v41, 7  ;;  %v3675_v46 = vld [vmem:[%s5251_s7 + $0x90] ss:$8 sps:$4 sm:$0xff]  }
 0x906   :  { %v3809_v2 = vpop.eup %3808  ;;  %v2074_v42 = vpack.c.bf16 %v4899_v50, %v2066_v41  ;;  %v4911_v27 = vmul.f32 %v3807_v60, %v4885_v63  ;;  %v2108_v44 = vrot.slane %v4899_v50, 1  ;;  %v2080_v37 = vrot.slane %v4899_v50, 7  ;;  %v3677_v41 = vld [vmem:[%s5251_s7 + $0x94] ss:$8 sps:$4 sm:$0xff]   ;;  %v3680_v60 = vld [vmem:[%s5251_s7 + $0xa4] ss:$8 sps:$4 sm:$0xff]  }
 0x907   :  { %v3811_v21 = vpop.eup %3810  ;;  %v4918_v38 = vmul.f32 %v3809_v2, %v4887_v1  ;;  %v2110_v45 = vrot.slane %v4904_v39, 1  ;;  %v4955_v48 = vsel %vm701_vm2, %v2105_v28, %v2107_v15  ;;  %v3683_v2 = vld [vmem:[%s5251_s7 + $0xb4] ss:$8 sps:$4 sm:$0xff]  }
 0x908   :  { %2389 = vmatprep.mubr.bf16.mxu0 %v2074_v42  ;;  %v2076_v47 = vpack.c.bf16 %v4911_v27, %v4904_v39  ;;  %v2084_v63 = vrot.slane %v4911_v27, 7  ;;  %v4935_v11 = vmul.f32 %v3811_v21, %v4889_v26  ;;  %v4951_v26 = vsel %vm701_vm2, %v2106_v24, %v2108_v44  ;;  %v3681_v42 = vld [vmem:[%s5251_s7 + $0xb0] ss:$8 sps:$4 sm:$0xff]   ;;  %v3684_v21 = vld [vmem:[%s5251_s7 + $0xc0] ss:$8 sps:$4 sm:$0xff]  }
 0x909   :  { %2390 = vmatmul.mubr.bf16.vlgmr.msra.gmra.mrb[8].mxu0 %v2073_v36  ;;  %v2109_v49 = vrot.slane %v4918_v38, 1  ;;  %v4929_v1 = vsel %vm701_vm2, %v2108_v44, %v2110_v45  ;;  %v2090_v62 = vsel %vm668_vm3, %v2078_v18, %v2080_v37  ;;  %v2112_v0 = vrot.slane %v4911_v27, 1  ;;  %v3678_v36 = vld [vmem:[%s5251_s7 + $0xa0] ss:$8 sps:$4 sm:$0xff]   ;;  %v3692_v44 = vld [vmem:[%s5251_s7 + $0xe4] ss:$8 sps:$4 sm:$0xff]  }
 0x90a   :  { %2571 = vmatpush1.bf16.msra.mxu0 %v3648_v12  ;;  %2399 = vmatprep.mubr.bf16.mxu0 %v2076_v47  ;;  %v2092_v34 = vsel %vm668_vm3, %v2084_v63, %v2078_v18  ;;  %v3142_v40 = vpack.c.bf16 %v4929_v1, %v4951_v26  ;;  %v2111_v4 = vrot.slane %v4935_v11, 1  ;;  %v2075_v61 = vpack.c.bf16 %v4935_v11, %v4918_v38  ;;  %v3686_v12 = vld [vmem:[%s5251_s7 + $0xc4] ss:$8 sps:$4 sm:$0xff]   ;;  %v3693_v18 = vld [vmem:[%s5251_s7 + $0xf0] ss:$8 sps:$4 sm:$0xff]  }
 0x90b   :  { %2572 = vmatprep.subr.bf16.mxu0 %v3653_v30  ;;  %v4943_v53 = vsel %vm701_vm2, %v2107_v15, %v2109_v49  ;;  %v3098_v23 = vpack.c.bf16 %v2090_v62, %v2092_v34  ;;  %v4977_v31 = vsel %vm701_vm2, %v2110_v45, %v2112_v0  ;;  %v4981_v17 = vsel %vm701_vm2, %v2112_v0, %v2106_v24  ;;  %v3687_v30 = vld [vmem:[%s5251_s7 + $0xd0] ss:$8 sps:$4 sm:$0xff]   ;;  %v3690_v45 = vld [vmem:[%s5251_s7 + $0xe0] ss:$8 sps:$4 sm:$0xff]   ;;  %v3695_v15 = vld [vmem:[%s5251_s7 + $0xf4] ss:$8 sps:$4 sm:$0xff]  }
 0x90c   :  { %v3145_v56 = vpack.c.bf16 %v4943_v53, %v4955_v48  ;;  %v4985_v6 = vsel %vm701_vm2, %v2109_v49, %v2111_v4  ;;  %v4989_v5 = vsel %vm701_vm2, %v2111_v4, %v2105_v28  ;;  %v3148_v10 = vpack.c.bf16 %v4981_v17, %v4977_v31  ;;  %v3689_v28 = vld [vmem:[%s5251_s7 + $0xd4] ss:$8 sps:$4 sm:$0xff]   ;;  %v3704_v62 = vld [vmem:[%s5251_s7 + $0x224] ss:$8 sps:$4 sm:$0xff]   ;;  %v3702_v4 = vld [vmem:[%s5251_s7 + $0x220] ss:$8 sps:$4 sm:$0xff]  }
 0x90d   :  { %v3151_v32 = vpack.c.bf16 %v4989_v5, %v4985_v6  ;;  %v2083_v47 = vrot.slane %v4935_v11, 7  ;;  %v2082_v24 = vrot.slane %v4904_v39, 7  ;;  %v2077_v49 = vrot.slane %v4895_v54, 7  ;;  %v3696_v11 = vld [vmem:[%s5251_s7 + $0x200] ss:$8 sps:$4 sm:$0xff]  }
 0x90e   :  { %2573 = vmatpush1.bf16.msra.mxu0 %v3651_v52  ;;  %v2079_v52 = vrot.slane %v4897_v35, 7  ;;  %v3701_v27 = vld [vmem:[%s5251_s7 + $0x214] ss:$8 sps:$4 sm:$0xff]   ;;  %v2081_v50 = vrot.slane %v4918_v38, 7  ;;  %v3711_v26 = vld [vmem:[%s5251_s7 + $0x250] ss:$8 sps:$4 sm:$0xff]  }
 0x90f   :  { %2574 = vmatprep.subr.bf16.mxu0 %v3656_v55  ;;  %v3698_v55 = vld [vmem:[%s5251_s7 + $0x204] ss:$8 sps:$4 sm:$0xff]   ;;  %v2091_v34 = vsel %vm668_vm3, %v2083_v47, %v2077_v49  ;;  %v2086_v54 = vsel %vm668_vm3, %v2082_v24, %v2084_v63  ;;  %v2088_v35 = vsel %vm668_vm3, %v2080_v37, %v2082_v24  ;;  %v3699_v37 = vld [vmem:[%s5251_s7 + $0x210] ss:$8 sps:$4 sm:$0xff]   ;;  %v3713_v1 = vld [vmem:[%s5251_s7 + $0x254] ss:$8 sps:$4 sm:$0xff]  }
 0x910   :  { %v2089_v39 = vsel %vm668_vm3, %v2077_v49, %v2079_v52  ;;  %v3104_v63 = vpack.c.bf16 %v2086_v54, %v2088_v35  ;;  %v2085_v0 = vsel %vm668_vm3, %v2081_v50, %v2083_v47  ;;  %v2087_v38 = vsel %vm668_vm3, %v2079_v52, %v2081_v50 }
 0x911   :  { %2400 = vmatmul.mubr.bf16.gmra.mrb[12].mxu0 %v2075_v61  ;;  %v3107_v61 = vpack.c.bf16 %v2085_v0, %v2087_v38 }
 0x912   :  { %2575 = vmatpush1.bf16.msra.mxu0 %v3654_v57  ;;  %3099 = vmatprep.mubr.msk.bf16.mxu0 %vm4394_vm6, %v3098_v23  ;;  %v3101_v57 = vpack.c.bf16 %v2089_v39, %v2091_v34  ;;  %v3707_v23 = vld [vmem:[%s5251_s7 + $0x234] ss:$8 sps:$4 sm:$0xff]  }
 0x913   :  { %2576 = vmatprep.subr.bf16.mxu0 %v3659_v43  ;;  %v3710_v43 = vld [vmem:[%s5251_s7 + $0x244] ss:$8 sps:$4 sm:$0xff]  }
 0x916   :  { %2577 = vmatpush1.bf16.msra.mxu0 %v3657_v22  ;;  %v3714_v22 = vld [vmem:[%s5251_s7 + $0x260] ss:$8 sps:$4 sm:$0xff]  }
 0x917   :  { %2578 = vmatprep.subr.bf16.mxu0 %v3662_v16  ;;  %v3719_v16 = vld [vmem:[%s5251_s7 + $0x274] ss:$8 sps:$4 sm:$0xff]  }
 0x91a   :  { %2579 = vmatpush1.bf16.msra.mxu0 %v3660_v3  ;;  %v3717_v3 = vld [vmem:[%s5251_s7 + $0x270] ss:$8 sps:$4 sm:$0xff]  }
 0x91b   :  { %2580 = vmatprep.subr.bf16.mxu0 %v3665_v7  ;;  %v3722_v7 = vld [vmem:[%s5251_s7 + $0x284] ss:$8 sps:$4 sm:$0xff]  }
 0x91e   :  { %2581 = vmatpush1.bf16.msra.mxu0 %v3663_v8  ;;  %v3720_v8 = vld [vmem:[%s5251_s7 + $0x280] ss:$8 sps:$4 sm:$0xff]  }
 0x91f   :  { %2582 = vmatprep.subr.bf16.mxu0 %v3668_v13  ;;  %v3725_v13 = vld [vmem:[%s5251_s7 + $0x294] ss:$8 sps:$4 sm:$0xff]  }
 0x922   :  { %2583 = vmatpush1.bf16.msra.mxu0 %v3666_v14  ;;  %v3723_v14 = vld [vmem:[%s5251_s7 + $0x290] ss:$8 sps:$4 sm:$0xff]  }
 0x923   :  { %2584 = vmatprep.subr.bf16.mxu0 %v3671_v19  ;;  %v3728_v19 = vld [vmem:[%s5251_s7 + $0x2a4] ss:$8 sps:$4 sm:$0xff]  }
 0x926   :  { %2585 = vmatpush1.bf16.msra.mxu0 %v3669_v20  ;;  %v3726_v20 = vld [vmem:[%s5251_s7 + $0x2a0] ss:$8 sps:$4 sm:$0xff]  }
 0x927   :  { %2586 = vmatprep.subr.bf16.mxu0 %v3674_v29  ;;  %v3731_v29 = vld [vmem:[%s5251_s7 + $0x2b4] ss:$8 sps:$4 sm:$0xff]  }
 0x92a   :  { %2587 = vmatpush1.bf16.msra.mxu0 %v3672_v25  ;;  %v3729_v25 = vld [vmem:[%s5251_s7 + $0x2b0] ss:$8 sps:$4 sm:$0xff]  }
 0x92b   :  { %2588 = vmatprep.subr.bf16.mxu0 %v3677_v41  ;;  %v3734_v41 = vld [vmem:[%s5251_s7 + $0x2c4] ss:$8 sps:$4 sm:$0xff]  }
 0x92e   :  { %2589 = vmatpush1.bf16.msra.mxu0 %v3675_v46  ;;  %v3732_v46 = vld [vmem:[%s5251_s7 + $0x2c0] ss:$8 sps:$4 sm:$0xff]  }
 0x92f   :  { %2590 = vmatprep.subr.bf16.mxu0 %v3680_v60  ;;  %v3737_v60 = vld [vmem:[%s5251_s7 + $0x2d4] ss:$8 sps:$4 sm:$0xff]  }
 0x932   :  { %2591 = vmatpush1.bf16.msra.mxu0 %v3678_v36  ;;  %v3735_v36 = vld [vmem:[%s5251_s7 + $0x2d0] ss:$8 sps:$4 sm:$0xff]  }
 0x933   :  { %2592 = vmatprep.subr.bf16.mxu0 %v3683_v2  ;;  %v3740_v2 = vld [vmem:[%s5251_s7 + $0x2e4] ss:$8 sps:$4 sm:$0xff]  }
 0x936   :  { %2593 = vmatpush1.bf16.msra.mxu0 %v3681_v42  ;;  %v3738_v42 = vld [vmem:[%s5251_s7 + $0x2e0] ss:$8 sps:$4 sm:$0xff]  }
 0x937   :  { %2594 = vmatprep.subr.bf16.mxu0 %v3686_v12  ;;  %v3743_v12 = vld [vmem:[%s5251_s7 + $0x2f4] ss:$8 sps:$4 sm:$0xff]  }
 0x93a   :  { %2595 = vmatpush1.bf16.msra.mxu0 %v3684_v21  ;;  %v3741_v21 = vld [vmem:[%s5251_s7 + $0x2f0] ss:$8 sps:$4 sm:$0xff]  }
 0x93b   :  { %2596 = vmatprep.subr.bf16.mxu0 %v3689_v28  ;;  %v2876_v28 = vld [vmem:[%s5254_s8] sm:$0x3] }
 0x93c   :  { %v2881_v53 = vrot.slane %v2876_v28, %v4121_v58  ;;  %v2885_v48 = vrot.slane %v2876_v28, %v4124_v59 }
 0x93e   :  { %2597 = vmatpush1.bf16.msra.mxu0 %v3687_v30 }
 0x93f   :  { %2598 = vmatprep.subr.bf16.mxu0 %v3692_v44 }
 0x942   :  { %2599 = vmatpush1.bf16.msra.mxu0 %v3690_v45 }
 0x943   :  { %2600 = vmatprep.subr.bf16.mxu0 %v3695_v15 }
 0x946   :  { %2601 = vmatpush1.bf16.msra.mxu0 %v3693_v18 }
 0x947   :  { %2815 = vmatprep.subr.bf16.mxu0 %v3698_v55 }
 0x949   :  { %3102 = vmatmul.mubr.msk.bf16.vlgmr.msra.gmra.mrb[8].mxu0 %vm4394_vm6, %v3101_v57 }
 0x94a   :  { %3105 = vmatprep.mubr.msk.bf16.mxu0 %vm4394_vm6, %v3104_v63  ;;  %2816 = vmatpush1.bf16.msra.mxu0 %v3696_v11 }
 0x94b   :  { %2817 = vmatprep.subr.bf16.mxu0 %v3701_v27 }
 0x94e   :  { %2818 = vmatpush1.bf16.msra.mxu0 %v3699_v37 }
 0x94f   :  { %2819 = vmatprep.subr.bf16.mxu0 %v3704_v62 }
 0x951   :  { %3108 = vmatmul.mubr.msk.bf16.gmra.mrb[12].mxu0 %vm4394_vm6, %v3107_v61 }
 0x952   :  { %2820 = vmatpush1.bf16.msra.mxu0 %v3702_v4  ;;  %3143 = vmatprep.mubr.msk.bf16.mxu0 %vm4543_vm8, %v3142_v40  ;;  %v3716_v40 = vld [vmem:[%s5251_s7 + $0x264] ss:$8 sps:$4 sm:$0xff]  }
 0x953   :  { %2821 = vmatprep.subr.bf16.mxu0 %v3707_v23 }
 0x956   :  { %2822 = vmatpush1.bf16.msra.mxu0 %v3705_v51 }
 0x957   :  { %2823 = vmatprep.subr.bf16.mxu0 %v3710_v43 }
 0x95a   :  { %2824 = vmatpush1.bf16.msra.mxu0 %v3708_v33 }
 0x95b   :  { %2825 = vmatprep.subr.bf16.mxu0 %v3713_v1 }
 0x95e   :  { %2826 = vmatpush1.bf16.msra.mxu0 %v3711_v26 }
 0x95f   :  { %2827 = vmatprep.subr.bf16.mxu0 %v3716_v40 }
 0x962   :  { %2828 = vmatpush1.bf16.msra.mxu0 %v3714_v22 }
 0x963   :  { %2829 = vmatprep.subr.bf16.mxu0 %v3719_v16 }
 0x966   :  { %2830 = vmatpush1.bf16.msra.mxu0 %v3717_v3 }
 0x967   :  { %2831 = vmatprep.subr.bf16.mxu0 %v3722_v7 }
 0x96a   :  { %2832 = vmatpush1.bf16.msra.mxu0 %v3720_v8 }
 0x96b   :  { %2833 = vmatprep.subr.bf16.mxu0 %v3725_v13 }
 0x96e   :  { %2834 = vmatpush1.bf16.msra.mxu0 %v3723_v14 }
 0x96f   :  { %2835 = vmatprep.subr.bf16.mxu0 %v3728_v19 }
 0x972   :  { %2836 = vmatpush1.bf16.msra.mxu0 %v3726_v20 }
 0x973   :  { %2837 = vmatprep.subr.bf16.mxu0 %v3731_v29 }
 0x976   :  { %2838 = vmatpush1.bf16.msra.mxu0 %v3729_v25 }
 0x977   :  { %2839 = vmatprep.subr.bf16.mxu0 %v3734_v41 }
 0x97a   :  { %2840 = vmatpush1.bf16.msra.mxu0 %v3732_v46 }
 0x97b   :  { %2841 = vmatprep.subr.bf16.mxu0 %v3737_v60 }
 0x97e   :  { %2842 = vmatpush1.bf16.msra.mxu0 %v3735_v36 }
 0x97f   :  { %2843 = vmatprep.subr.bf16.mxu0 %v3740_v2 }
 0x982   :  { %2844 = vmatpush1.bf16.msra.mxu0 %v3738_v42 }
 0x983   :  { %2845 = vmatprep.subr.bf16.mxu0 %v3743_v12 }
 0x986   :  { %2846 = vmatpush1.bf16.msra.mxu0 %v3741_v21 }
 0x989   :  { %3146 = vmatmul.mubr.msk.bf16.vlgmr.msra.gmra.mrb[8].mxu0 %vm4543_vm8, %v3145_v56 }
 0x98a   :  { %3149 = vmatprep.mubr.msk.bf16.mxu0 %vm4543_vm8, %v3148_v10 }
 0x991   :  { %3152 = vmatmul.mubr.msk.bf16.gmra.mrb[12].mxu0 %vm4543_vm8, %v3151_v32 }
 0xa5c   :  { %v2849_v56 = vpop.f32.mrb[8].mxu0 }
 0xa5d   :  { %v2888_v30 = vadd.f32 %v2881_v53, %v2849_v56  ;;  %v2851_v31 = vpop.f32.mrb[9].mxu0 }
 0xa5e   :  { %v2889_v17 = vadd.f32 %v2885_v48, %v2851_v31  ;;  %v2853_v44 = vpop.f32.mrb[10].mxu0 }
 0xa5f   :  { %2896 = vst [vmem:[%s5255_s11] sm:$0xff] %v2888_v30  ;;  %v2890_v6 = vadd.f32 %v2881_v53, %v2853_v44  ;;  %v2855_v9 = vpop.f32.mrb[11].mxu0 }
 0xa60   :  { %2897 = vst [vmem:[%s5255_s11 + $0x8] sm:$0xff] %v2889_v17  ;;  %v2891_v5 = vadd.f32 %v2885_v48, %v2855_v9 }
 0xa61   :  { %2898 = vst [vmem:[%s5255_s11 + $0x10] sm:$0xff] %v2890_v6 }
 0xa62   :  { %2899 = vst [vmem:[%s5255_s11 + $0x18] sm:$0xff] %v2891_v5 }
 0xa64   :  { %v2859_v58 = vpop.f32.mrb[12].mxu0 }
 0xa65   :  { %v2892_v59 = vadd.f32 %v2881_v53, %v2859_v58  ;;  %v2861_v10 = vpop.f32.mrb[13].mxu0 }
 0xa66   :  { %v2893_v32 = vadd.f32 %v2885_v48, %v2861_v10  ;;  %v2863_v45 = vpop.f32.mrb[14].mxu0 }
 0xa67   :  { %2900 = vst [vmem:[%s5255_s11 + $0x20] sm:$0xff] %v2892_v59  ;;  %v2894_v15 = vadd.f32 %v2881_v53, %v2863_v45  ;;  %v2865_v47 = vpop.f32.mrb[15].mxu0 }
 0xa68   :  { %2901 = vst [vmem:[%s5255_s11 + $0x28] sm:$0xff] %v2893_v32  ;;  %v2895_v24 = vadd.f32 %v2885_v48, %v2865_v47 }
 0xa69   :  { %2902 = vst [vmem:[%s5255_s11 + $0x30] sm:$0xff] %v2894_v15 }
 0xa6a   :  { %2903 = vst [vmem:[%s5255_s11 + $0x38] sm:$0xff] %v2895_v24 }

</bundles_post_ra>
